<compile_context>
chip_gen: v5e
topology: v5e:2x2
jax: 0.10.0
libtpu: 0.0.40
codegen_flags: <defaults>
</compile_context>

<pallas_src>
import functools
import math

import jax
import jax.numpy as jnp
from jax import lax
from jax.experimental import pallas as pl
from jax.experimental.pallas import tpu as pltpu


# ----------------------- generation dispatch (VMEM / tiles) -----------------------

def _detect_vmem_capacity():
    try:
        info = pltpu.get_tpu_info()
        for name in ("vmem_capacity_bytes", "vmem_size_bytes", "vmem_bytes"):
            cap = getattr(info, name, None)
            if cap:
                return int(cap)
    except Exception:
        pass
    return 64 * 1024 * 1024          # conservative default (v7x-sized)


_VMEM_CAP = _detect_vmem_capacity()
_BIG_VMEM = _VMEM_CAP >= 100 * 1024 * 1024          # v5e / v6e (128 MiB parts)
VMEM_LIMIT = min(100 * 1024 * 1024, (_VMEM_CAP * 3) // 4)   # ~96 MiB big parts, 48 MiB v7x

# minimum 16 rows (bf16 sublane packing); seq tiles capped at 256 (MXU-friendly on
# v5e's 128-wide and v6e/v7x's 256-wide MXUs).
_ROW_CANDS = (1024, 512, 256, 128, 64, 32, 16) if _BIG_VMEM else (512, 256, 128, 64, 32, 16)
_SEQ_CANDS = (256, 128, 64, 32, 16)
_DH_CANDS = (2048, 1024, 512, 256, 128)
_VOCAB_CANDS = (4096, 2048, 1024, 512, 256, 128)
_VOCAB_TILE = 2048                                  # vocab is padded to a multiple of this


def _tile(n, cands):
    """Largest candidate tile dividing n; else the full extent (always a legal block)."""
    for c in cands:
        if n % c == 0:
            return c
    return n


def _round_up(n, m):
    return ((n + m - 1) // m) * m


# ----------------------------- in-kernel helpers -----------------------------

def _layernorm(x, scale, shift, eps=1e-5):
    # matches torch: mean / biased var over last dim, computed in f32
    m = jnp.mean(x, axis=-1, keepdims=True)
    c = x - m
    v = jnp.mean(c * c, axis=-1, keepdims=True)
    return scale * (c * lax.rsqrt(v + eps)) + shift


_GELU_C = math.sqrt(2.0 / math.pi)


def _gelu(x):
    # tanh-approx GELU, exactly as the reference GELU module (f32 math)
    return 0.5 * x * (1.0 + jnp.tanh(_GELU_C * (x + 0.044715 * x ** 3)))


# ------------------------------ Pallas kernels -------------------------------

def ln_qkv_kernel(x_ref, s_ref, b_ref, w_ref, o_ref):
    """LayerNorm1 + one of the {Q,K,V} projections: (tr, D) -> (tr, D) bf16.

    grid = (3, row_tiles); the (D, D) weight block (index j) stays resident while
    all row tiles stream underneath it, so only one weight is in VMEM at a time.
    """
    xn = _layernorm(x_ref[...], s_ref[...], b_ref[...]).astype(jnp.bfloat16)
    o_ref[0] = jnp.dot(xn, w_ref[0],
                       preferred_element_type=jnp.float32).astype(o_ref.dtype)


def flash_attn_kernel(q_ref, k_ref, v_ref, o_ref, m_sc, l_sc, acc_sc,
                      *, tq, tk, scale, H, hd):
    """Causal flash attention; grid = (B, q_tiles, kv_tiles).

    Blocks are (1, 1, t, D) slices of the fused (3, B, T, D) QKV buffer; all heads
    of a tile are processed in-kernel (per-head 2D MXU matmuls), output is written
    lane-dense into (B, T, D).
    """
    qi = pl.program_id(1)
    ki = pl.program_id(2)

    @pl.when(ki == 0)
    def _():
        m_sc[...] = jnp.full_like(m_sc, -jnp.inf)
        l_sc[...] = jnp.zeros_like(l_sc)
        acc_sc[...] = jnp.zeros_like(acc_sc)

    # Causal skip: with tq == tk a KV tile is needed iff ki <= qi.  (The K/V
    # BlockSpecs are also clamped to min(ki, qi), so skipped tiles issue no DMA.)
    @pl.when(ki <= qi)
    def _():
        qpos = qi * tq + lax.broadcasted_iota(jnp.int32, (tq, tk), 0)
        kpos = ki * tk + lax.broadcasted_iota(jnp.int32, (tq, tk), 1)
        bias = jnp.where(kpos > qpos, jnp.float32(-1e30), jnp.float32(0.0))
        for h in range(H):
            cols = slice(h * hd, (h + 1) * hd)
            qh = q_ref[0, 0, :, cols]                  # (tq, hd) bf16
            kh = k_ref[0, 0, :, cols]                  # (tk, hd) bf16
            vh = v_ref[0, 0, :, cols]                  # (tk, hd) bf16
            s = lax.dot_general(qh, kh, (((1,), (1,)), ((), ())),
                                preferred_element_type=jnp.float32)
            s = s * scale + bias
            m_prev = m_sc[h]
            m_new = jnp.maximum(m_prev, jnp.max(s, axis=-1, keepdims=True))
            alpha = jnp.exp(m_prev - m_new)
            p = jnp.exp(s - m_new)
            l_sc[h] = alpha * l_sc[h] + jnp.sum(p, axis=-1, keepdims=True)
            acc_sc[h] = alpha * acc_sc[h] + jnp.dot(
                p.astype(vh.dtype), vh, preferred_element_type=jnp.float32)
            m_sc[h] = m_new

    # Finalize at the diagonal tile (last KV tile that contributes to this q tile).
    @pl.when(ki == qi)
    def _():
        for h in range(H):
            cols = slice(h * hd, (h + 1) * hd)
            # exact divide (approx reciprocal was flagged as a correctness concern)
            o_ref[0, :, cols] = (acc_sc[h] / l_sc[h]).astype(o_ref.dtype)


def proj_ff_kernel(ctx_ref, x_ref, wo_ref, bo_ref, s2_ref, sh2_ref,
                   w1_ref, b1_ref, w2_ref, b2_ref, o_ref,
                   xres_sc, xn_sc, acc_sc):
    """out_proj + residual + LN2 + GELU MLP + residual.

    grid = (row_tiles, Dh_tiles); w1/w2 are streamed one Dh tile at a time and the
    second FF matmul is accumulated in VMEM scratch (pl.when-finalized), so the big
    FF weights are never fully resident.
    """
    j = pl.program_id(1)

    @pl.when(j == 0)
    def _():
        attn = jnp.dot(ctx_ref[...], wo_ref[...],
                       preferred_element_type=jnp.float32) + bo_ref[...]
        xr = x_ref[...] + attn                          # residual (dropout p=0)
        xres_sc[...] = xr
        xn_sc[...] = _layernorm(xr, s2_ref[...], sh2_ref[...]).astype(jnp.bfloat16)
        acc_sc[...] = jnp.zeros_like(acc_sc)

    h = jnp.dot(xn_sc[...], w1_ref[...],
                preferred_element_type=jnp.float32) + b1_ref[...]
    h = _gelu(h)
    acc_sc[...] = acc_sc[...] + jnp.dot(h.astype(jnp.bfloat16), w2_ref[...],
                                        preferred_element_type=jnp.float32)

    @pl.when(j == pl.num_programs(1) - 1)
    def _():
        o_ref[...] = xres_sc[...] + acc_sc[...] + b2_ref[...]   # residual (dropout p=0)


def final_ln_kernel(x_ref, s_ref, b_ref, o_ref):
    """Final LayerNorm, hoisted out of the lm_head so it runs once per row tile."""
    o_ref[...] = _layernorm(x_ref[...], s_ref[...], b_ref[...]).astype(o_ref.dtype)


def lm_head_kernel(x_ref, w_ref, o_ref):
    """out_head (no bias), tiled over (vocab, rows); vocab is pre-padded to the tile."""
    o_ref[...] = jnp.dot(x_ref[...], w_ref[...],
                         preferred_element_type=jnp.float32).astype(o_ref.dtype)


# ------------------------------ pallas_call wrappers --------------------------

def ln_qkv(x, ln_s, ln_b, wqkv):
    """x: (N, D) f32, wqkv: (3, D, D) bf16 -> (3, N, D) bf16."""
    N, D = x.shape
    tr = _tile(N, _ROW_CANDS)
    return pl.pallas_call(
        ln_qkv_kernel,
        out_shape=jax.ShapeDtypeStruct((3, N, D), jnp.bfloat16),
        grid=(3, N // tr),                      # weight (j) outer, rows (i) inner
        in_specs=[
            pl.BlockSpec((tr, D), lambda j, i: (i, 0)),
            pl.BlockSpec((1, D), lambda j, i: (0, 0)),
            pl.BlockSpec((1, D), lambda j, i: (0, 0)),
            pl.BlockSpec((1, D, D), lambda j, i: (j, 0, 0)),
        ],
        out_specs=pl.BlockSpec((1, tr, D), lambda j, i: (j, i, 0)),
        compiler_params=pltpu.CompilerParams(
            dimension_semantics=("arbitrary", "parallel"),
            vmem_limit_bytes=VMEM_LIMIT),
    )(x, ln_s, ln_b, wqkv)


def flash_attention(qkv, scale, H):
    """qkv: (3, B, T, D) bf16 -> ctx (B, T, D) bf16."""
    _, B, T, D = qkv.shape
    hd = D // H
    tq = _tile(T, _SEQ_CANDS)
    tk = tq                                      # causal skip relies on tq == tk
    kernel = functools.partial(flash_attn_kernel, tq=tq, tk=tk, scale=scale,
                               H=H, hd=hd)
    return pl.pallas_call(
        kernel,
        out_shape=jax.ShapeDtypeStruct((B, T, D), jnp.bfloat16),
        grid=(B, T // tq, T // tk),
        in_specs=[
            pl.BlockSpec((1, 1, tq, D), lambda b, qi, ki: (0, b, qi, 0)),
            # clamp to the causal frontier: fully-future KV tiles re-use the
            # resident block (no DMA).
            pl.BlockSpec((1, 1, tk, D),
                         lambda b, qi, ki: (1, b, jnp.minimum(ki, qi), 0)),
            pl.BlockSpec((1, 1, tk, D),
                         lambda b, qi, ki: (2, b, jnp.minimum(ki, qi), 0)),
        ],
        out_specs=pl.BlockSpec((1, tq, D), lambda b, qi, ki: (b, qi, 0)),
        scratch_shapes=[
            pltpu.VMEM((H, tq, 1), jnp.float32),    # running max
            pltpu.VMEM((H, tq, 1), jnp.float32),    # running denom
            pltpu.VMEM((H, tq, hd), jnp.float32),   # running numerator
        ],
        compiler_params=pltpu.CompilerParams(
            dimension_semantics=("parallel", "parallel", "arbitrary"),
            vmem_limit_bytes=VMEM_LIMIT),
    )(qkv, qkv, qkv)


def proj_ff(ctx, x, blk):
    """ctx: (N, D) bf16, x: (N, D) f32 residual -> (N, D) f32."""
    N, D = x.shape
    Dh = blk['w1'].shape[1]
    tr = _tile(N, _ROW_CANDS)
    tdh = _tile(Dh, _DH_CANDS)
    row = lambda i, j: (i, 0)
    const = lambda i, j: (0, 0)
    return pl.pallas_call(
        proj_ff_kernel,
        out_shape=jax.ShapeDtypeStruct((N, D), jnp.float32),
        grid=(N // tr, Dh // tdh),
        in_specs=[
            pl.BlockSpec((tr, D), row),                      # ctx (bf16)
            pl.BlockSpec((tr, D), row),                      # x residual (f32)
            pl.BlockSpec((D, D), const),                     # wo
            pl.BlockSpec((1, D), const),                     # bo
            pl.BlockSpec((1, D), const),                     # ln2 scale
            pl.BlockSpec((1, D), const),                     # ln2 shift
            pl.BlockSpec((D, tdh), lambda i, j: (0, j)),     # w1 tile
            pl.BlockSpec((1, tdh), lambda i, j: (0, j)),     # b1 tile
            pl.BlockSpec((tdh, D), lambda i, j: (j, 0)),     # w2 tile
            pl.BlockSpec((1, D), const),                     # b2
        ],
        out_specs=pl.BlockSpec((tr, D), row),
        scratch_shapes=[
            pltpu.VMEM((tr, D), jnp.float32),    # residual (x + attn)
            pltpu.VMEM((tr, D), jnp.bfloat16),   # LN2(x) matmul operand
            pltpu.VMEM((tr, D), jnp.float32),    # FF accumulator
        ],
        input_output_aliases={1: 0},             # residual buffer reused as output
        compiler_params=pltpu.CompilerParams(
            dimension_semantics=("parallel", "arbitrary"),
            vmem_limit_bytes=VMEM_LIMIT),
    )(ctx, x, blk['wo'], blk['bo'], blk['ln2_s'], blk['ln2_b'],
      blk['w1'], blk['b1'], blk['w2'], blk['b2'])


def final_ln(x, ln_s, ln_b):
    N, D = x.shape
    tr = _tile(N, _ROW_CANDS)
    return pl.pallas_call(
        final_ln_kernel,
        out_shape=jax.ShapeDtypeStruct((N, D), jnp.bfloat16),
        grid=(N // tr,),
        in_specs=[pl.BlockSpec((tr, D), lambda i: (i, 0)),
                  pl.BlockSpec((1, D), lambda i: (0, 0)),
                  pl.BlockSpec((1, D), lambda i: (0, 0))],
        out_specs=pl.BlockSpec((tr, D), lambda i: (i, 0)),
        compiler_params=pltpu.CompilerParams(
            dimension_semantics=("parallel",),
            vmem_limit_bytes=VMEM_LIMIT),
    )(x, ln_s, ln_b)


def lm_head(xn, w_vocab, vocab_size):
    """xn: (N, D) bf16, w_vocab: (D, Vp) bf16 (vocab pre-padded) -> (N, V) f32."""
    N, D = xn.shape
    Vp = w_vocab.shape[1]
    tr = _tile(N, _ROW_CANDS)
    tv = _tile(Vp, _VOCAB_CANDS)
    out = pl.pallas_call(
        lm_head_kernel,
        out_shape=jax.ShapeDtypeStruct((N, Vp), jnp.float32),
        # vocab axis outermost: each (D, tv) weight block is fetched once and all
        # row tiles stream underneath it (the small activation re-fetches instead
        # of the huge vocab weight re-streaming).
        grid=(Vp // tv, N // tr),
        in_specs=[
            pl.BlockSpec((tr, D), lambda j, i: (i, 0)),
            pl.BlockSpec((D, tv), lambda j, i: (0, j)),
        ],
        out_specs=pl.BlockSpec((tr, tv), lambda j, i: (i, j)),
        compiler_params=pltpu.CompilerParams(
            dimension_semantics=("parallel", "parallel"),
            vmem_limit_bytes=VMEM_LIMIT),
    )(xn, w_vocab)
    if Vp != vocab_size:
        out = out[:, :vocab_size]
    return out


# ------------------------------ model forward ---------------------------------

def gpt_forward(in_idx, params, cfg):
    B, T = in_idx.shape
    D = cfg['emb_dim']
    H = cfg['n_heads']
    hd = D // H
    N = B * T

    # TODO(synk): token/position embedding gathers are left to XLA (jnp.take);
    # drop_emb with p=0 is an identity.
    tok = jnp.take(params['tok_emb'], in_idx, axis=0)        # (B, T, D)
    pos = params['pos_emb'][:T]                              # (T, D)
    x = (tok + pos[None, :, :]).reshape(N, D)                # (N, D) f32 residual

    scale = 1.0 / math.sqrt(hd)
    for blk in params['blocks']:
        qkv = ln_qkv(x, blk['ln1_s'], blk['ln1_b'], blk['wqkv'])   # (3, N, D) bf16
        qkv = qkv.reshape(3, B, T, D)                              # free reshape
        ctx = flash_attention(qkv, scale, H)                       # (B, T, D) bf16
        x = proj_ff(ctx.reshape(N, D), x, blk)                     # (N, D) f32

    xn = final_ln(x, params['fn_s'], params['fn_b'])               # (N, D) bf16
    logits = lm_head(xn, params['out_head_t'], cfg['vocab_size'])  # (N, V) f32
    return logits.reshape(B, T, -1)


# ------------------------------ parameters ------------------------------------

def init_params(key, cfg):
    """PyTorch-layout float32 parameters (Linear weights are (out, in))."""
    D, V, C = cfg['emb_dim'], cfg['vocab_size'], cfg['context_length']

    def nrm(k, shape, s=0.02):
        return (s * jax.random.normal(k, shape)).astype(jnp.float32)

    keys = jax.random.split(key, 3 + cfg['n_layers'])
    params = {
        'tok_emb': nrm(keys[0], (V, D)),
        'pos_emb': nrm(keys[1], (C, D)),
        'fn_s': jnp.ones((D,), jnp.float32),
        'fn_b': jnp.zeros((D,), jnp.float32),
        'out_head': nrm(keys[2], (V, D)),          # Linear(D, V, bias=False)
        'blocks': [],
    }
    for i in range(cfg['n_layers']):
        bks = jax.random.split(keys[3 + i], 6)
        params['blocks'].append({
            'ln1_s': jnp.ones((D,), jnp.float32),
            'ln1_b': jnp.zeros((D,), jnp.float32),
            'wq': nrm(bks[0], (D, D)),             # qkv_bias=False
            'wk': nrm(bks[1], (D, D)),
            'wv': nrm(bks[2], (D, D)),
            'wo': nrm(bks[3], (D, D)),
            'bo': jnp.zeros((D,), jnp.float32),
            'ln2_s': jnp.ones((D,), jnp.float32),
            'ln2_b': jnp.zeros((D,), jnp.float32),
            'w1': nrm(bks[4], (4 * D, D)),
            'b1': jnp.zeros((4 * D,), jnp.float32),
            'w2': nrm(bks[5], (D, 4 * D)),
            'b2': jnp.zeros((D,), jnp.float32),
        })
    return params


def prepare_params(p, cfg):
    """Pre-transpose Linear weights to (in, out), stack QKV as (3, D, D), pad the
    vocab to a tile multiple, cast matmul weights to bf16, and store LN params /
    biases as (1, N) VMEM-friendly rows."""
    D, V = cfg['emb_dim'], cfg['vocab_size']

    def row(v):
        return v.reshape(1, -1).astype(jnp.float32)

    # vocab padding: pick the padded size so a large lane-dense tile divides it.
    tv = min(_VOCAB_TILE, _round_up(V, 128))
    Vp = _round_up(V, tv)
    w_head = p['out_head'].T                                      # (D, V)
    if Vp != V:
        w_head = jnp.pad(w_head, ((0, 0), (0, Vp - V)))

    out = {
        'tok_emb': p['tok_emb'],
        'pos_emb': p['pos_emb'],
        'fn_s': row(p['fn_s']),
        'fn_b': row(p['fn_b']),
        'out_head_t': w_head.astype(jnp.bfloat16),                # (D, Vp)
        'blocks': [],
    }
    for b in p['blocks']:
        wqkv = jnp.stack([b['wq'].T, b['wk'].T, b['wv'].T], axis=0)  # (3, D, D)
        out['blocks'].append({
            'ln1_s': row(b['ln1_s']), 'ln1_b': row(b['ln1_b']),
            'wqkv': wqkv.astype(jnp.bfloat16),
            'wo': b['wo'].T.astype(jnp.bfloat16),                  # (D, D)
            'bo': row(b['bo']),
            'ln2_s': row(b['ln2_s']), 'ln2_b': row(b['ln2_b']),
            'w1': b['w1'].T.astype(jnp.bfloat16),                  # (D, 4D)
            'b1': row(b['b1']),
            'w2': b['w2'].T.astype(jnp.bfloat16),                  # (4D, D)
            'b2': row(b['b2']),
        })
    return out


# ----------------------------------- main --------------------------------------

if __name__ == "__main__":
    cfg = {
        'vocab_size': 256,
        'context_length': 16,
        'emb_dim': 32,
        'n_heads': 4,
        'n_layers': 2,
        'drop_rate': 0.0,     # identity dropout
        'qkv_bias': False,
    }

    key = jax.random.PRNGKey(0)
    k_idx, k_par = jax.random.split(key)
    params = prepare_params(init_params(k_par, cfg), cfg)

    batch, seq_len = 2, 8
    in_idx = jax.random.randint(k_idx, (batch, seq_len), 0, cfg['vocab_size'],
                                dtype=jnp.int32)

    fwd = jax.jit(functools.partial(gpt_forward, cfg=cfg))
    logits = jax.block_until_ready(fwd(in_idx, params))

    assert logits.shape == (batch, seq_len, cfg['vocab_size'])
    assert bool(jnp.all(jnp.isfinite(logits)))
    print("KERNEL_OK")
</pallas_src>

<mosaic_0001>
module attributes {stable_mosaic.version = 11 : i64} {
  func.func @ln_qkv_kernel(%arg0: i32, %arg1: i32, %arg2: memref<16x32xf32, #tpu.memory_space<vmem>>, %arg3: memref<1x32xf32, #tpu.memory_space<vmem>>, %arg4: memref<1x32xf32, #tpu.memory_space<vmem>>, %arg5: memref<1x32x32xbf16, #tpu.memory_space<vmem>>, %arg6: memref<1x16x32xbf16, #tpu.memory_space<vmem>>) attributes {dimension_semantics = [#tpu.dimension_semantics<arbitrary>, #tpu.dimension_semantics<parallel>], iteration_bounds = array<i64: 3, 1>, scalar_prefetch = 0 : i64, scratch_operands = 0 : i64, tpu.core_type = #tpu.core_type<tc>, window_params = [{transform_indices = @transform_0, window_bounds = array<i64: 16, 32>}, {pipeline_mode = #tpu.pipeline_mode<synchronous>, transform_indices = @transform_1, window_bounds = array<i64: 1, 32>}, {pipeline_mode = #tpu.pipeline_mode<synchronous>, transform_indices = @transform_2, window_bounds = array<i64: 1, 32>}, {transform_indices = @transform_3, window_bounds = array<i64: 1, 32, 32>}, {transform_indices = @transform_4, window_bounds = array<i64: 1, 16, 32>}]} {
    %c0 = arith.constant 0 : index
    %c0_0 = arith.constant 0 : index
    %0 = vector.load %arg2[%c0, %c0_0] : memref<16x32xf32, #tpu.memory_space<vmem>>, vector<16x32xf32>
    %c0_1 = arith.constant 0 : index
    %c0_2 = arith.constant 0 : index
    %1 = vector.load %arg3[%c0_1, %c0_2] : memref<1x32xf32, #tpu.memory_space<vmem>>, vector<1x32xf32>
    %c0_3 = arith.constant 0 : index
    %c0_4 = arith.constant 0 : index
    %2 = vector.load %arg4[%c0_3, %c0_4] : memref<1x32xf32, #tpu.memory_space<vmem>>, vector<1x32xf32>
    %cst = arith.constant dense<0.000000e+00> : vector<16xf32>
    %3 = vector.multi_reduction <add>, %0, %cst [1] : vector<16x32xf32> to vector<16xf32>
    %4 = vector.shape_cast %3 : vector<16xf32> to vector<16x1xf32>
    %cst_5 = arith.constant 3.200000e+01 : f32
    %5 = vector.broadcast %cst_5 : f32 to vector<16x1xf32>
    %6 = arith.divf %4, %5 : vector<16x1xf32>
    %7 = vector.broadcast %6 : vector<16x1xf32> to vector<16x32xf32>
    %8 = arith.subf %0, %7 : vector<16x32xf32>
    %9 = arith.mulf %8, %8 : vector<16x32xf32>
    %cst_6 = arith.constant dense<0.000000e+00> : vector<16xf32>
    %10 = vector.multi_reduction <add>, %9, %cst_6 [1] : vector<16x32xf32> to vector<16xf32>
    %11 = vector.shape_cast %10 : vector<16xf32> to vector<16x1xf32>
    %cst_7 = arith.constant 3.200000e+01 : f32
    %12 = vector.broadcast %cst_7 : f32 to vector<16x1xf32>
    %13 = arith.divf %11, %12 : vector<16x1xf32>
    %cst_8 = arith.constant 9.99999974E-6 : f32
    %14 = vector.broadcast %cst_8 : f32 to vector<16x1xf32>
    %15 = arith.addf %13, %14 : vector<16x1xf32>
    %16 = math.rsqrt %15 : vector<16x1xf32>
    %17 = vector.broadcast %16 : vector<16x1xf32> to vector<16x32xf32>
    %18 = arith.mulf %8, %17 : vector<16x32xf32>
    %19 = vector.broadcast %1 : vector<1x32xf32> to vector<16x32xf32>
    %20 = arith.mulf %19, %18 : vector<16x32xf32>
    %21 = vector.broadcast %2 : vector<1x32xf32> to vector<16x32xf32>
    %22 = arith.addf %20, %21 : vector<16x32xf32>
    %23 = arith.truncf %22 : vector<16x32xf32> to vector<16x32xbf16>
    %c0_9 = arith.constant 0 : index
    %c0_10 = arith.constant 0 : index
    %c0_11 = arith.constant 0 : index
    %24 = vector.load %arg5[%c0_9, %c0_10, %c0_11] : memref<1x32x32xbf16, #tpu.memory_space<vmem>>, vector<1x32x32xbf16>
    %25 = vector.shape_cast %24 : vector<1x32x32xbf16> to vector<32x32xbf16>
    %cst_12 = arith.constant dense<0.000000e+00> : vector<16x32xf32>
    %26 = tpu.matmul %23, %25, %cst_12 {dimension_numbers = #tpu.dot_dimension_numbers<[1], [0], [0], [1], [0, 0, 1, 1], [], []>} : vector<16x32xbf16>, vector<32x32xbf16>, vector<16x32xf32> -> vector<16x32xf32>
    %27 = arith.truncf %26 : vector<16x32xf32> to vector<16x32xbf16>
    %c0_13 = arith.constant 0 : index
    %c0_14 = arith.constant 0 : index
    %c0_15 = arith.constant 0 : index
    %28 = vector.load %arg6[%c0_13, %c0_14, %c0_15] : memref<1x16x32xbf16, #tpu.memory_space<vmem>>, vector<1x16x32xbf16>
    %29 = vector.shape_cast %28 : vector<1x16x32xbf16> to vector<16x32xbf16>
    %30 = vector.shape_cast %27 : vector<16x32xbf16> to vector<1x16x32xbf16>
    tpu.vector_store %arg6[%c0_13, %c0_14, %c0_15], %30 {strides = array<i32>} : memref<1x16x32xbf16, #tpu.memory_space<vmem>>, vector<1x16x32xbf16>,
    return
  }
  func.func @transform_0(%arg0: i32, %arg1: i32) -> (i32, i32) {
    %c0_i32 = arith.constant 0 : i32
    %c0_i32_0 = arith.constant 0 : i32
    return %arg1, %c0_i32 : i32, i32
  }
  func.func @transform_1(%arg0: i32, %arg1: i32) -> (i32, i32) {
    %c0_i32 = arith.constant 0 : i32
    %c0_i32_0 = arith.constant 0 : i32
    %c0_i32_1 = arith.constant 0 : i32
    return %c0_i32, %c0_i32_0 : i32, i32
  }
  func.func @transform_2(%arg0: i32, %arg1: i32) -> (i32, i32) {
    %c0_i32 = arith.constant 0 : i32
    %c0_i32_0 = arith.constant 0 : i32
    %c0_i32_1 = arith.constant 0 : i32
    return %c0_i32, %c0_i32_0 : i32, i32
  }
  func.func @transform_3(%arg0: i32, %arg1: i32) -> (i32, i32, i32) {
    %c0_i32 = arith.constant 0 : i32
    %c0_i32_0 = arith.constant 0 : i32
    %c0_i32_1 = arith.constant 0 : i32
    return %arg0, %c0_i32, %c0_i32_0 : i32, i32, i32
  }
  func.func @transform_4(%arg0: i32, %arg1: i32) -> (i32, i32, i32) {
    %c0_i32 = arith.constant 0 : i32
    %c0_i32_0 = arith.constant 0 : i32
    return %arg0, %arg1, %c0_i32 : i32, i32, i32
  }
}

module attributes {stable_mosaic.version = 11 : i64} {
  func.func @flash_attn_kernel(%arg0: i32, %arg1: i32, %arg2: i32, %arg3: memref<1x1x8x32xbf16, #tpu.memory_space<vmem>>, %arg4: memref<1x1x8x32xbf16, #tpu.memory_space<vmem>>, %arg5: memref<1x1x8x32xbf16, #tpu.memory_space<vmem>>, %arg6: memref<1x8x32xbf16, #tpu.memory_space<vmem>>, %arg7: memref<4x8x1xf32, #tpu.memory_space<vmem>>, %arg8: memref<4x8x1xf32, #tpu.memory_space<vmem>>, %arg9: memref<4x8x8xf32, #tpu.memory_space<vmem>>) attributes {dimension_semantics = [#tpu.dimension_semantics<parallel>, #tpu.dimension_semantics<parallel>, #tpu.dimension_semantics<arbitrary>], iteration_bounds = array<i64: 2, 1, 1>, scalar_prefetch = 0 : i64, scratch_operands = 3 : i64, tpu.core_type = #tpu.core_type<tc>, window_params = [{transform_indices = @transform_0, window_bounds = array<i64: 1, 1, 8, 32>}, {transform_indices = @transform_1, window_bounds = array<i64: 1, 1, 8, 32>}, {transform_indices = @transform_2, window_bounds = array<i64: 1, 1, 8, 32>}, {transform_indices = @transform_3, window_bounds = array<i64: 1, 8, 32>}]} {
    %c0_i32 = arith.constant 0 : i32
    %0 = arith.cmpi eq, %arg2, %c0_i32 : i32
    %1 = arith.extui %0 : i1 to i32
    %c0_i32_0 = arith.constant 0 : i32
    %2 = arith.cmpi ne, %1, %c0_i32_0 : i32
    scf.if %2 {
      %cst = arith.constant 0xFF800000 : f32
      %9 = vector.broadcast %cst : f32 to vector<4x8x1xf32>
      %c0 = arith.constant 0 : index
      %c0_3 = arith.constant 0 : index
      %c0_4 = arith.constant 0 : index
      %10 = vector.load %arg7[%c0, %c0_3, %c0_4] : memref<4x8x1xf32, #tpu.memory_space<vmem>>, vector<4x8x1xf32>
      tpu.vector_store %arg7[%c0, %c0_3, %c0_4], %9 {strides = array<i32>} : memref<4x8x1xf32, #tpu.memory_space<vmem>>, vector<4x8x1xf32>,
      %cst_5 = arith.constant 0.000000e+00 : f32
      %11 = vector.broadcast %cst_5 : f32 to vector<4x8x1xf32>
      %c0_6 = arith.constant 0 : index
      %c0_7 = arith.constant 0 : index
      %c0_8 = arith.constant 0 : index
      %12 = vector.load %arg8[%c0_6, %c0_7, %c0_8] : memref<4x8x1xf32, #tpu.memory_space<vmem>>, vector<4x8x1xf32>
      tpu.vector_store %arg8[%c0_6, %c0_7, %c0_8], %11 {strides = array<i32>} : memref<4x8x1xf32, #tpu.memory_space<vmem>>, vector<4x8x1xf32>,
      %cst_9 = arith.constant 0.000000e+00 : f32
      %13 = vector.broadcast %cst_9 : f32 to vector<4x8x8xf32>
      %c0_10 = arith.constant 0 : index
      %c0_11 = arith.constant 0 : index
      %c0_12 = arith.constant 0 : index
      %14 = vector.load %arg9[%c0_10, %c0_11, %c0_12] : memref<4x8x8xf32, #tpu.memory_space<vmem>>, vector<4x8x8xf32>
      tpu.vector_store %arg9[%c0_10, %c0_11, %c0_12], %13 {strides = array<i32>} : memref<4x8x8xf32, #tpu.memory_space<vmem>>, vector<4x8x8xf32>,
    } else {
    }
    %3 = arith.cmpi sle, %arg2, %arg1 : i32
    %4 = arith.extui %3 : i1 to i32
    %c0_i32_1 = arith.constant 0 : i32
    %5 = arith.cmpi ne, %4, %c0_i32_1 : i32
    scf.if %5 {
      %c8_i32 = arith.constant 8 : i32
      %9 = arith.muli %arg1, %c8_i32 : i32
      %10 = tpu.iota {dimensions = array<i32: 0>} : vector<8x8xi32>
      %11 = vector.broadcast %9 : i32 to vector<8x8xi32>
      %12 = arith.addi %11, %10 : vector<8x8xi32>
      %c8_i32_3 = arith.constant 8 : i32
      %13 = arith.muli %arg2, %c8_i32_3 : i32
      %14 = tpu.iota {dimensions = array<i32: 1>} : vector<8x8xi32>
      %15 = vector.broadcast %13 : i32 to vector<8x8xi32>
      %16 = arith.addi %15, %14 : vector<8x8xi32>
      %17 = arith.cmpi sgt, %16, %12 : vector<8x8xi32>
      %cst = arith.constant -1.000000e+30 : f32
      %cst_4 = arith.constant 0.000000e+00 : f32
      %18 = vector.broadcast %cst : f32 to vector<8x8xf32>
      %19 = vector.broadcast %cst_4 : f32 to vector<8x8xf32>
      %20 = arith.select %17, %18, %19 : vector<8x8xi1>, vector<8x8xf32>
      %c0 = arith.constant 0 : index
      %c0_5 = arith.constant 0 : index
      %c0_6 = arith.constant 0 : index
      %c0_7 = arith.constant 0 : index
      %21 = vector.load %arg3[%c0, %c0_5, %c0_6, %c0_7] : memref<1x1x8x32xbf16, #tpu.memory_space<vmem>>, vector<1x1x8x8xbf16>
      %22 = vector.shape_cast %21 : vector<1x1x8x8xbf16> to vector<8x8xbf16>
      %c0_8 = arith.constant 0 : index
      %c0_9 = arith.constant 0 : index
      %c0_10 = arith.constant 0 : index
      %c0_11 = arith.constant 0 : index
      %23 = vector.load %arg4[%c0_8, %c0_9, %c0_10, %c0_11] : memref<1x1x8x32xbf16, #tpu.memory_space<vmem>>, vector<1x1x8x8xbf16>
      %24 = vector.shape_cast %23 : vector<1x1x8x8xbf16> to vector<8x8xbf16>
      %c0_12 = arith.constant 0 : index
      %c0_13 = arith.constant 0 : index
      %c0_14 = arith.constant 0 : index
      %c0_15 = arith.constant 0 : index
      %25 = vector.load %arg5[%c0_12, %c0_13, %c0_14, %c0_15] : memref<1x1x8x32xbf16, #tpu.memory_space<vmem>>, vector<1x1x8x8xbf16>
      %26 = vector.shape_cast %25 : vector<1x1x8x8xbf16> to vector<8x8xbf16>
      %cst_16 = arith.constant dense<0.000000e+00> : vector<8x8xf32>
      %27 = tpu.matmul %22, %24, %cst_16 {dimension_numbers = #tpu.dot_dimension_numbers<[1], [1], [0], [0], [0, 0, 1, 0], [], []>} : vector<8x8xbf16>, vector<8x8xbf16>, vector<8x8xf32> -> vector<8x8xf32>
      %cst_17 = arith.constant 0.353553385 : f32
      %28 = vector.broadcast %cst_17 : f32 to vector<8x8xf32>
      %29 = arith.mulf %27, %28 : vector<8x8xf32>
      %30 = arith.addf %29, %20 : vector<8x8xf32>
      %c0_18 = arith.constant 0 : index
      %c0_19 = arith.constant 0 : index
      %c0_20 = arith.constant 0 : index
      %31 = vector.load %arg7[%c0_18, %c0_19, %c0_20] : memref<4x8x1xf32, #tpu.memory_space<vmem>>, vector<1x8x1xf32>
      %32 = vector.shape_cast %31 : vector<1x8x1xf32> to vector<8x1xf32>
      %cst_21 = arith.constant dense<0xFF800000> : vector<8xf32>
      %33 = vector.multi_reduction <maximumf>, %30, %cst_21 [1] : vector<8x8xf32> to vector<8xf32>
      %34 = vector.shape_cast %33 : vector<8xf32> to vector<8x1xf32>
      %35 = arith.maximumf %32, %34 : vector<8x1xf32>
      %36 = arith.subf %32, %35 : vector<8x1xf32>
      %37 = math.exp %36 : vector<8x1xf32>
      %38 = vector.broadcast %35 : vector<8x1xf32> to vector<8x8xf32>
      %39 = arith.subf %30, %38 : vector<8x8xf32>
      %40 = math.exp %39 : vector<8x8xf32>
      %c0_22 = arith.constant 0 : index
      %c0_23 = arith.constant 0 : index
      %c0_24 = arith.constant 0 : index
      %41 = vector.load %arg8[%c0_22, %c0_23, %c0_24] : memref<4x8x1xf32, #tpu.memory_space<vmem>>, vector<1x8x1xf32>
      %42 = vector.shape_cast %41 : vector<1x8x1xf32> to vector<8x1xf32>
      %43 = arith.mulf %37, %42 : vector<8x1xf32>
      %cst_25 = arith.constant dense<0.000000e+00> : vector<8xf32>
      %44 = vector.multi_reduction <add>, %40, %cst_25 [1] : vector<8x8xf32> to vector<8xf32>
      %45 = vector.shape_cast %44 : vector<8xf32> to vector<8x1xf32>
      %46 = arith.addf %43, %45 : vector<8x1xf32>
      %c0_26 = arith.constant 0 : index
      %c0_27 = arith.constant 0 : index
      %c0_28 = arith.constant 0 : index
      %47 = vector.load %arg8[%c0_26, %c0_27, %c0_28] : memref<4x8x1xf32, #tpu.memory_space<vmem>>, vector<1x8x1xf32>
      %48 = vector.shape_cast %47 : vector<1x8x1xf32> to vector<8x1xf32>
      %49 = vector.shape_cast %46 : vector<8x1xf32> to vector<1x8x1xf32>
      tpu.vector_store %arg8[%c0_26, %c0_27, %c0_28], %49 {strides = array<i32>} : memref<4x8x1xf32, #tpu.memory_space<vmem>>, vector<1x8x1xf32>,
      %c0_29 = arith.constant 0 : index
      %c0_30 = arith.constant 0 : index
      %c0_31 = arith.constant 0 : index
      %50 = vector.load %arg9[%c0_29, %c0_30, %c0_31] : memref<4x8x8xf32, #tpu.memory_space<vmem>>, vector<1x8x8xf32>
      %51 = vector.shape_cast %50 : vector<1x8x8xf32> to vector<8x8xf32>
      %52 = vector.broadcast %37 : vector<8x1xf32> to vector<8x8xf32>
      %53 = arith.mulf %52, %51 : vector<8x8xf32>
      %54 = arith.truncf %40 : vector<8x8xf32> to vector<8x8xbf16>
      %cst_32 = arith.constant dense<0.000000e+00> : vector<8x8xf32>
      %55 = tpu.matmul %54, %26, %cst_32 {dimension_numbers = #tpu.dot_dimension_numbers<[1], [0], [0], [1], [0, 0, 1, 1], [], []>} : vector<8x8xbf16>, vector<8x8xbf16>, vector<8x8xf32> -> vector<8x8xf32>
      %56 = arith.addf %53, %55 : vector<8x8xf32>
      %c0_33 = arith.constant 0 : index
      %c0_34 = arith.constant 0 : index
      %c0_35 = arith.constant 0 : index
      %57 = vector.load %arg9[%c0_33, %c0_34, %c0_35] : memref<4x8x8xf32, #tpu.memory_space<vmem>>, vector<1x8x8xf32>
      %58 = vector.shape_cast %57 : vector<1x8x8xf32> to vector<8x8xf32>
      %59 = vector.shape_cast %56 : vector<8x8xf32> to vector<1x8x8xf32>
      tpu.vector_store %arg9[%c0_33, %c0_34, %c0_35], %59 {strides = array<i32>} : memref<4x8x8xf32, #tpu.memory_space<vmem>>, vector<1x8x8xf32>,
      %c0_36 = arith.constant 0 : index
      %c0_37 = arith.constant 0 : index
      %c0_38 = arith.constant 0 : index
      %60 = vector.load %arg7[%c0_36, %c0_37, %c0_38] : memref<4x8x1xf32, #tpu.memory_space<vmem>>, vector<1x8x1xf32>
      %61 = vector.shape_cast %60 : vector<1x8x1xf32> to vector<8x1xf32>
      %62 = vector.shape_cast %35 : vector<8x1xf32> to vector<1x8x1xf32>
      tpu.vector_store %arg7[%c0_36, %c0_37, %c0_38], %62 {strides = array<i32>} : memref<4x8x1xf32, #tpu.memory_space<vmem>>, vector<1x8x1xf32>,
      %c0_39 = arith.constant 0 : index
      %c0_40 = arith.constant 0 : index
      %c0_41 = arith.constant 0 : index
      %c8 = arith.constant 8 : index
      %63 = vector.load %arg3[%c0_39, %c0_40, %c0_41, %c8] : memref<1x1x8x32xbf16, #tpu.memory_space<vmem>>, vector<1x1x8x8xbf16>
      %64 = vector.shape_cast %63 : vector<1x1x8x8xbf16> to vector<8x8xbf16>
      %c0_42 = arith.constant 0 : index
      %c0_43 = arith.constant 0 : index
      %c0_44 = arith.constant 0 : index
      %c8_45 = arith.constant 8 : index
      %65 = vector.load %arg4[%c0_42, %c0_43, %c0_44, %c8_45] : memref<1x1x8x32xbf16, #tpu.memory_space<vmem>>, vector<1x1x8x8xbf16>
      %66 = vector.shape_cast %65 : vector<1x1x8x8xbf16> to vector<8x8xbf16>
      %c0_46 = arith.constant 0 : index
      %c0_47 = arith.constant 0 : index
      %c0_48 = arith.constant 0 : index
      %c8_49 = arith.constant 8 : index
      %67 = vector.load %arg5[%c0_46, %c0_47, %c0_48, %c8_49] : memref<1x1x8x32xbf16, #tpu.memory_space<vmem>>, vector<1x1x8x8xbf16>
      %68 = vector.shape_cast %67 : vector<1x1x8x8xbf16> to vector<8x8xbf16>
      %cst_50 = arith.constant dense<0.000000e+00> : vector<8x8xf32>
      %69 = tpu.matmul %64, %66, %cst_50 {dimension_numbers = #tpu.dot_dimension_numbers<[1], [1], [0], [0], [0, 0, 1, 0], [], []>} : vector<8x8xbf16>, vector<8x8xbf16>, vector<8x8xf32> -> vector<8x8xf32>
      %cst_51 = arith.constant 0.353553385 : f32
      %70 = vector.broadcast %cst_51 : f32 to vector<8x8xf32>
      %71 = arith.mulf %69, %70 : vector<8x8xf32>
      %72 = arith.addf %71, %20 : vector<8x8xf32>
      %c1 = arith.constant 1 : index
      %c0_52 = arith.constant 0 : index
      %c0_53 = arith.constant 0 : index
      %73 = vector.load %arg7[%c1, %c0_52, %c0_53] : memref<4x8x1xf32, #tpu.memory_space<vmem>>, vector<1x8x1xf32>
      %74 = vector.shape_cast %73 : vector<1x8x1xf32> to vector<8x1xf32>
      %cst_54 = arith.constant dense<0xFF800000> : vector<8xf32>
      %75 = vector.multi_reduction <maximumf>, %72, %cst_54 [1] : vector<8x8xf32> to vector<8xf32>
      %76 = vector.shape_cast %75 : vector<8xf32> to vector<8x1xf32>
      %77 = arith.maximumf %74, %76 : vector<8x1xf32>
      %78 = arith.subf %74, %77 : vector<8x1xf32>
      %79 = math.exp %78 : vector<8x1xf32>
      %80 = vector.broadcast %77 : vector<8x1xf32> to vector<8x8xf32>
      %81 = arith.subf %72, %80 : vector<8x8xf32>
      %82 = math.exp %81 : vector<8x8xf32>
      %c1_55 = arith.constant 1 : index
      %c0_56 = arith.constant 0 : index
      %c0_57 = arith.constant 0 : index
      %83 = vector.load %arg8[%c1_55, %c0_56, %c0_57] : memref<4x8x1xf32, #tpu.memory_space<vmem>>, vector<1x8x1xf32>
      %84 = vector.shape_cast %83 : vector<1x8x1xf32> to vector<8x1xf32>
      %85 = arith.mulf %79, %84 : vector<8x1xf32>
      %cst_58 = arith.constant dense<0.000000e+00> : vector<8xf32>
      %86 = vector.multi_reduction <add>, %82, %cst_58 [1] : vector<8x8xf32> to vector<8xf32>
      %87 = vector.shape_cast %86 : vector<8xf32> to vector<8x1xf32>
      %88 = arith.addf %85, %87 : vector<8x1xf32>
      %c1_59 = arith.constant 1 : index
      %c0_60 = arith.constant 0 : index
      %c0_61 = arith.constant 0 : index
      %89 = vector.load %arg8[%c1_59, %c0_60, %c0_61] : memref<4x8x1xf32, #tpu.memory_space<vmem>>, vector<1x8x1xf32>
      %90 = vector.shape_cast %89 : vector<1x8x1xf32> to vector<8x1xf32>
      %91 = vector.shape_cast %88 : vector<8x1xf32> to vector<1x8x1xf32>
      tpu.vector_store %arg8[%c1_59, %c0_60, %c0_61], %91 {strides = array<i32>} : memref<4x8x1xf32, #tpu.memory_space<vmem>>, vector<1x8x1xf32>,
      %c1_62 = arith.constant 1 : index
      %c0_63 = arith.constant 0 : index
      %c0_64 = arith.constant 0 : index
      %92 = vector.load %arg9[%c1_62, %c0_63, %c0_64] : memref<4x8x8xf32, #tpu.memory_space<vmem>>, vector<1x8x8xf32>
      %93 = vector.shape_cast %92 : vector<1x8x8xf32> to vector<8x8xf32>
      %94 = vector.broadcast %79 : vector<8x1xf32> to vector<8x8xf32>
      %95 = arith.mulf %94, %93 : vector<8x8xf32>
      %96 = arith.truncf %82 : vector<8x8xf32> to vector<8x8xbf16>
      %cst_65 = arith.constant dense<0.000000e+00> : vector<8x8xf32>
      %97 = tpu.matmul %96, %68, %cst_65 {dimension_numbers = #tpu.dot_dimension_numbers<[1], [0], [0], [1], [0, 0, 1, 1], [], []>} : vector<8x8xbf16>, vector<8x8xbf16>, vector<8x8xf32> -> vector<8x8xf32>
      %98 = arith.addf %95, %97 : vector<8x8xf32>
      %c1_66 = arith.constant 1 : index
      %c0_67 = arith.constant 0 : index
      %c0_68 = arith.constant 0 : index
      %99 = vector.load %arg9[%c1_66, %c0_67, %c0_68] : memref<4x8x8xf32, #tpu.memory_space<vmem>>, vector<1x8x8xf32>
      %100 = vector.shape_cast %99 : vector<1x8x8xf32> to vector<8x8xf32>
      %101 = vector.shape_cast %98 : vector<8x8xf32> to vector<1x8x8xf32>
      tpu.vector_store %arg9[%c1_66, %c0_67, %c0_68], %101 {strides = array<i32>} : memref<4x8x8xf32, #tpu.memory_space<vmem>>, vector<1x8x8xf32>,
      %c1_69 = arith.constant 1 : index
      %c0_70 = arith.constant 0 : index
      %c0_71 = arith.constant 0 : index
      %102 = vector.load %arg7[%c1_69, %c0_70, %c0_71] : memref<4x8x1xf32, #tpu.memory_space<vmem>>, vector<1x8x1xf32>
      %103 = vector.shape_cast %102 : vector<1x8x1xf32> to vector<8x1xf32>
      %104 = vector.shape_cast %77 : vector<8x1xf32> to vector<1x8x1xf32>
      tpu.vector_store %arg7[%c1_69, %c0_70, %c0_71], %104 {strides = array<i32>} : memref<4x8x1xf32, #tpu.memory_space<vmem>>, vector<1x8x1xf32>,
      %c0_72 = arith.constant 0 : index
      %c0_73 = arith.constant 0 : index
      %c0_74 = arith.constant 0 : index
      %c16 = arith.constant 16 : index
      %105 = vector.load %arg3[%c0_72, %c0_73, %c0_74, %c16] : memref<1x1x8x32xbf16, #tpu.memory_space<vmem>>, vector<1x1x8x8xbf16>
      %106 = vector.shape_cast %105 : vector<1x1x8x8xbf16> to vector<8x8xbf16>
      %c0_75 = arith.constant 0 : index
      %c0_76 = arith.constant 0 : index
      %c0_77 = arith.constant 0 : index
      %c16_78 = arith.constant 16 : index
      %107 = vector.load %arg4[%c0_75, %c0_76, %c0_77, %c16_78] : memref<1x1x8x32xbf16, #tpu.memory_space<vmem>>, vector<1x1x8x8xbf16>
      %108 = vector.shape_cast %107 : vector<1x1x8x8xbf16> to vector<8x8xbf16>
      %c0_79 = arith.constant 0 : index
      %c0_80 = arith.constant 0 : index
      %c0_81 = arith.constant 0 : index
      %c16_82 = arith.constant 16 : index
      %109 = vector.load %arg5[%c0_79, %c0_80, %c0_81, %c16_82] : memref<1x1x8x32xbf16, #tpu.memory_space<vmem>>, vector<1x1x8x8xbf16>
      %110 = vector.shape_cast %109 : vector<1x1x8x8xbf16> to vector<8x8xbf16>
      %cst_83 = arith.constant dense<0.000000e+00> : vector<8x8xf32>
      %111 = tpu.matmul %106, %108, %cst_83 {dimension_numbers = #tpu.dot_dimension_numbers<[1], [1], [0], [0], [0, 0, 1, 0], [], []>} : vector<8x8xbf16>, vector<8x8xbf16>, vector<8x8xf32> -> vector<8x8xf32>
      %cst_84 = arith.constant 0.353553385 : f32
      %112 = vector.broadcast %cst_84 : f32 to vector<8x8xf32>
      %113 = arith.mulf %111, %112 : vector<8x8xf32>
      %114 = arith.addf %113, %20 : vector<8x8xf32>
      %c2 = arith.constant 2 : index
      %c0_85 = arith.constant 0 : index
      %c0_86 = arith.constant 0 : index
      %115 = vector.load %arg7[%c2, %c0_85, %c0_86] : memref<4x8x1xf32, #tpu.memory_space<vmem>>, vector<1x8x1xf32>
      %116 = vector.shape_cast %115 : vector<1x8x1xf32> to vector<8x1xf32>
      %cst_87 = arith.constant dense<0xFF800000> : vector<8xf32>
      %117 = vector.multi_reduction <maximumf>, %114, %cst_87 [1] : vector<8x8xf32> to vector<8xf32>
      %118 = vector.shape_cast %117 : vector<8xf32> to vector<8x1xf32>
      %119 = arith.maximumf %116, %118 : vector<8x1xf32>
      %120 = arith.subf %116, %119 : vector<8x1xf32>
      %121 = math.exp %120 : vector<8x1xf32>
      %122 = vector.broadcast %119 : vector<8x1xf32> to vector<8x8xf32>
      %123 = arith.subf %114, %122 : vector<8x8xf32>
      %124 = math.exp %123 : vector<8x8xf32>
      %c2_88 = arith.constant 2 : index
      %c0_89 = arith.constant 0 : index
      %c0_90 = arith.constant 0 : index
      %125 = vector.load %arg8[%c2_88, %c0_89, %c0_90] : memref<4x8x1xf32, #tpu.memory_space<vmem>>, vector<1x8x1xf32>
      %126 = vector.shape_cast %125 : vector<1x8x1xf32> to vector<8x1xf32>
      %127 = arith.mulf %121, %126 : vector<8x1xf32>
      %cst_91 = arith.constant dense<0.000000e+00> : vector<8xf32>
      %128 = vector.multi_reduction <add>, %124, %cst_91 [1] : vector<8x8xf32> to vector<8xf32>
      %129 = vector.shape_cast %128 : vector<8xf32> to vector<8x1xf32>
      %130 = arith.addf %127, %129 : vector<8x1xf32>
      %c2_92 = arith.constant 2 : index
      %c0_93 = arith.constant 0 : index
      %c0_94 = arith.constant 0 : index
      %131 = vector.load %arg8[%c2_92, %c0_93, %c0_94] : memref<4x8x1xf32, #tpu.memory_space<vmem>>, vector<1x8x1xf32>
      %132 = vector.shape_cast %131 : vector<1x8x1xf32> to vector<8x1xf32>
      %133 = vector.shape_cast %130 : vector<8x1xf32> to vector<1x8x1xf32>
      tpu.vector_store %arg8[%c2_92, %c0_93, %c0_94], %133 {strides = array<i32>} : memref<4x8x1xf32, #tpu.memory_space<vmem>>, vector<1x8x1xf32>,
      %c2_95 = arith.constant 2 : index
      %c0_96 = arith.constant 0 : index
      %c0_97 = arith.constant 0 : index
      %134 = vector.load %arg9[%c2_95, %c0_96, %c0_97] : memref<4x8x8xf32, #tpu.memory_space<vmem>>, vector<1x8x8xf32>
      %135 = vector.shape_cast %134 : vector<1x8x8xf32> to vector<8x8xf32>
      %136 = vector.broadcast %121 : vector<8x1xf32> to vector<8x8xf32>
      %137 = arith.mulf %136, %135 : vector<8x8xf32>
      %138 = arith.truncf %124 : vector<8x8xf32> to vector<8x8xbf16>
      %cst_98 = arith.constant dense<0.000000e+00> : vector<8x8xf32>
      %139 = tpu.matmul %138, %110, %cst_98 {dimension_numbers = #tpu.dot_dimension_numbers<[1], [0], [0], [1], [0, 0, 1, 1], [], []>} : vector<8x8xbf16>, vector<8x8xbf16>, vector<8x8xf32> -> vector<8x8xf32>
      %140 = arith.addf %137, %139 : vector<8x8xf32>
      %c2_99 = arith.constant 2 : index
      %c0_100 = arith.constant 0 : index
      %c0_101 = arith.constant 0 : index
      %141 = vector.load %arg9[%c2_99, %c0_100, %c0_101] : memref<4x8x8xf32, #tpu.memory_space<vmem>>, vector<1x8x8xf32>
      %142 = vector.shape_cast %141 : vector<1x8x8xf32> to vector<8x8xf32>
      %143 = vector.shape_cast %140 : vector<8x8xf32> to vector<1x8x8xf32>
      tpu.vector_store %arg9[%c2_99, %c0_100, %c0_101], %143 {strides = array<i32>} : memref<4x8x8xf32, #tpu.memory_space<vmem>>, vector<1x8x8xf32>,
      %c2_102 = arith.constant 2 : index
      %c0_103 = arith.constant 0 : index
      %c0_104 = arith.constant 0 : index
      %144 = vector.load %arg7[%c2_102, %c0_103, %c0_104] : memref<4x8x1xf32, #tpu.memory_space<vmem>>, vector<1x8x1xf32>
      %145 = vector.shape_cast %144 : vector<1x8x1xf32> to vector<8x1xf32>
      %146 = vector.shape_cast %119 : vector<8x1xf32> to vector<1x8x1xf32>
      tpu.vector_store %arg7[%c2_102, %c0_103, %c0_104], %146 {strides = array<i32>} : memref<4x8x1xf32, #tpu.memory_space<vmem>>, vector<1x8x1xf32>,
      %c0_105 = arith.constant 0 : index
      %c0_106 = arith.constant 0 : index
      %c0_107 = arith.constant 0 : index
      %c24 = arith.constant 24 : index
      %147 = vector.load %arg3[%c0_105, %c0_106, %c0_107, %c24] : memref<1x1x8x32xbf16, #tpu.memory_space<vmem>>, vector<1x1x8x8xbf16>
      %148 = vector.shape_cast %147 : vector<1x1x8x8xbf16> to vector<8x8xbf16>
      %c0_108 = arith.constant 0 : index
      %c0_109 = arith.constant 0 : index
      %c0_110 = arith.constant 0 : index
      %c24_111 = arith.constant 24 : index
      %149 = vector.load %arg4[%c0_108, %c0_109, %c0_110, %c24_111] : memref<1x1x8x32xbf16, #tpu.memory_space<vmem>>, vector<1x1x8x8xbf16>
      %150 = vector.shape_cast %149 : vector<1x1x8x8xbf16> to vector<8x8xbf16>
      %c0_112 = arith.constant 0 : index
      %c0_113 = arith.constant 0 : index
      %c0_114 = arith.constant 0 : index
      %c24_115 = arith.constant 24 : index
      %151 = vector.load %arg5[%c0_112, %c0_113, %c0_114, %c24_115] : memref<1x1x8x32xbf16, #tpu.memory_space<vmem>>, vector<1x1x8x8xbf16>
      %152 = vector.shape_cast %151 : vector<1x1x8x8xbf16> to vector<8x8xbf16>
      %cst_116 = arith.constant dense<0.000000e+00> : vector<8x8xf32>
      %153 = tpu.matmul %148, %150, %cst_116 {dimension_numbers = #tpu.dot_dimension_numbers<[1], [1], [0], [0], [0, 0, 1, 0], [], []>} : vector<8x8xbf16>, vector<8x8xbf16>, vector<8x8xf32> -> vector<8x8xf32>
      %cst_117 = arith.constant 0.353553385 : f32
      %154 = vector.broadcast %cst_117 : f32 to vector<8x8xf32>
      %155 = arith.mulf %153, %154 : vector<8x8xf32>
      %156 = arith.addf %155, %20 : vector<8x8xf32>
      %c3 = arith.constant 3 : index
      %c0_118 = arith.constant 0 : index
      %c0_119 = arith.constant 0 : index
      %157 = vector.load %arg7[%c3, %c0_118, %c0_119] : memref<4x8x1xf32, #tpu.memory_space<vmem>>, vector<1x8x1xf32>
      %158 = vector.shape_cast %157 : vector<1x8x1xf32> to vector<8x1xf32>
      %cst_120 = arith.constant dense<0xFF800000> : vector<8xf32>
      %159 = vector.multi_reduction <maximumf>, %156, %cst_120 [1] : vector<8x8xf32> to vector<8xf32>
      %160 = vector.shape_cast %159 : vector<8xf32> to vector<8x1xf32>
      %161 = arith.maximumf %158, %160 : vector<8x1xf32>
      %162 = arith.subf %158, %161 : vector<8x1xf32>
      %163 = math.exp %162 : vector<8x1xf32>
      %164 = vector.broadcast %161 : vector<8x1xf32> to vector<8x8xf32>
      %165 = arith.subf %156, %164 : vector<8x8xf32>
      %166 = math.exp %165 : vector<8x8xf32>
      %c3_121 = arith.constant 3 : index
      %c0_122 = arith.constant 0 : index
      %c0_123 = arith.constant 0 : index
      %167 = vector.load %arg8[%c3_121, %c0_122, %c0_123] : memref<4x8x1xf32, #tpu.memory_space<vmem>>, vector<1x8x1xf32>
      %168 = vector.shape_cast %167 : vector<1x8x1xf32> to vector<8x1xf32>
      %169 = arith.mulf %163, %168 : vector<8x1xf32>
      %cst_124 = arith.constant dense<0.000000e+00> : vector<8xf32>
      %170 = vector.multi_reduction <add>, %166, %cst_124 [1] : vector<8x8xf32> to vector<8xf32>
      %171 = vector.shape_cast %170 : vector<8xf32> to vector<8x1xf32>
      %172 = arith.addf %169, %171 : vector<8x1xf32>
      %c3_125 = arith.constant 3 : index
      %c0_126 = arith.constant 0 : index
      %c0_127 = arith.constant 0 : index
      %173 = vector.load %arg8[%c3_125, %c0_126, %c0_127] : memref<4x8x1xf32, #tpu.memory_space<vmem>>, vector<1x8x1xf32>
      %174 = vector.shape_cast %173 : vector<1x8x1xf32> to vector<8x1xf32>
      %175 = vector.shape_cast %172 : vector<8x1xf32> to vector<1x8x1xf32>
      tpu.vector_store %arg8[%c3_125, %c0_126, %c0_127], %175 {strides = array<i32>} : memref<4x8x1xf32, #tpu.memory_space<vmem>>, vector<1x8x1xf32>,
      %c3_128 = arith.constant 3 : index
      %c0_129 = arith.constant 0 : index
      %c0_130 = arith.constant 0 : index
      %176 = vector.load %arg9[%c3_128, %c0_129, %c0_130] : memref<4x8x8xf32, #tpu.memory_space<vmem>>, vector<1x8x8xf32>
      %177 = vector.shape_cast %176 : vector<1x8x8xf32> to vector<8x8xf32>
      %178 = vector.broadcast %163 : vector<8x1xf32> to vector<8x8xf32>
      %179 = arith.mulf %178, %177 : vector<8x8xf32>
      %180 = arith.truncf %166 : vector<8x8xf32> to vector<8x8xbf16>
      %cst_131 = arith.constant dense<0.000000e+00> : vector<8x8xf32>
      %181 = tpu.matmul %180, %152, %cst_131 {dimension_numbers = #tpu.dot_dimension_numbers<[1], [0], [0], [1], [0, 0, 1, 1], [], []>} : vector<8x8xbf16>, vector<8x8xbf16>, vector<8x8xf32> -> vector<8x8xf32>
      %182 = arith.addf %179, %181 : vector<8x8xf32>
      %c3_132 = arith.constant 3 : index
      %c0_133 = arith.constant 0 : index
      %c0_134 = arith.constant 0 : index
      %183 = vector.load %arg9[%c3_132, %c0_133, %c0_134] : memref<4x8x8xf32, #tpu.memory_space<vmem>>, vector<1x8x8xf32>
      %184 = vector.shape_cast %183 : vector<1x8x8xf32> to vector<8x8xf32>
      %185 = vector.shape_cast %182 : vector<8x8xf32> to vector<1x8x8xf32>
      tpu.vector_store %arg9[%c3_132, %c0_133, %c0_134], %185 {strides = array<i32>} : memref<4x8x8xf32, #tpu.memory_space<vmem>>, vector<1x8x8xf32>,
      %c3_135 = arith.constant 3 : index
      %c0_136 = arith.constant 0 : index
      %c0_137 = arith.constant 0 : index
      %186 = vector.load %arg7[%c3_135, %c0_136, %c0_137] : memref<4x8x1xf32, #tpu.memory_space<vmem>>, vector<1x8x1xf32>
      %187 = vector.shape_cast %186 : vector<1x8x1xf32> to vector<8x1xf32>
      %188 = vector.shape_cast %161 : vector<8x1xf32> to vector<1x8x1xf32>
      tpu.vector_store %arg7[%c3_135, %c0_136, %c0_137], %188 {strides = array<i32>} : memref<4x8x1xf32, #tpu.memory_space<vmem>>, vector<1x8x1xf32>,
    } else {
    }
    %6 = arith.cmpi eq, %arg2, %arg1 : i32
    %7 = arith.extui %6 : i1 to i32
    %c0_i32_2 = arith.constant 0 : i32
    %8 = arith.cmpi ne, %7, %c0_i32_2 : i32
    scf.if %8 {
      %c0 = arith.constant 0 : index
      %c0_3 = arith.constant 0 : index
      %c0_4 = arith.constant 0 : index
      %9 = vector.load %arg9[%c0, %c0_3, %c0_4] : memref<4x8x8xf32, #tpu.memory_space<vmem>>, vector<1x8x8xf32>
      %10 = vector.shape_cast %9 : vector<1x8x8xf32> to vector<8x8xf32>
      %c0_5 = arith.constant 0 : index
      %c0_6 = arith.constant 0 : index
      %c0_7 = arith.constant 0 : index
      %11 = vector.load %arg8[%c0_5, %c0_6, %c0_7] : memref<4x8x1xf32, #tpu.memory_space<vmem>>, vector<1x8x1xf32>
      %12 = vector.shape_cast %11 : vector<1x8x1xf32> to vector<8x1xf32>
      %13 = vector.broadcast %12 : vector<8x1xf32> to vector<8x8xf32>
      %14 = arith.divf %10, %13 : vector<8x8xf32>
      %15 = arith.truncf %14 : vector<8x8xf32> to vector<8x8xbf16>
      %c0_8 = arith.constant 0 : index
      %c0_9 = arith.constant 0 : index
      %c0_10 = arith.constant 0 : index
      %16 = vector.load %arg6[%c0_8, %c0_9, %c0_10] : memref<1x8x32xbf16, #tpu.memory_space<vmem>>, vector<1x8x8xbf16>
      %17 = vector.shape_cast %16 : vector<1x8x8xbf16> to vector<8x8xbf16>
      %18 = vector.shape_cast %15 : vector<8x8xbf16> to vector<1x8x8xbf16>
      tpu.vector_store %arg6[%c0_8, %c0_9, %c0_10], %18 {strides = array<i32>} : memref<1x8x32xbf16, #tpu.memory_space<vmem>>, vector<1x8x8xbf16>,
      %c1 = arith.constant 1 : index
      %c0_11 = arith.constant 0 : index
      %c0_12 = arith.constant 0 : index
      %19 = vector.load %arg9[%c1, %c0_11, %c0_12] : memref<4x8x8xf32, #tpu.memory_space<vmem>>, vector<1x8x8xf32>
      %20 = vector.shape_cast %19 : vector<1x8x8xf32> to vector<8x8xf32>
      %c1_13 = arith.constant 1 : index
      %c0_14 = arith.constant 0 : index
      %c0_15 = arith.constant 0 : index
      %21 = vector.load %arg8[%c1_13, %c0_14, %c0_15] : memref<4x8x1xf32, #tpu.memory_space<vmem>>, vector<1x8x1xf32>
      %22 = vector.shape_cast %21 : vector<1x8x1xf32> to vector<8x1xf32>
      %23 = vector.broadcast %22 : vector<8x1xf32> to vector<8x8xf32>
      %24 = arith.divf %20, %23 : vector<8x8xf32>
      %25 = arith.truncf %24 : vector<8x8xf32> to vector<8x8xbf16>
      %c0_16 = arith.constant 0 : index
      %c0_17 = arith.constant 0 : index
      %c8 = arith.constant 8 : index
      %26 = vector.load %arg6[%c0_16, %c0_17, %c8] : memref<1x8x32xbf16, #tpu.memory_space<vmem>>, vector<1x8x8xbf16>
      %27 = vector.shape_cast %26 : vector<1x8x8xbf16> to vector<8x8xbf16>
      %28 = vector.shape_cast %25 : vector<8x8xbf16> to vector<1x8x8xbf16>
      tpu.vector_store %arg6[%c0_16, %c0_17, %c8], %28 {strides = array<i32>} : memref<1x8x32xbf16, #tpu.memory_space<vmem>>, vector<1x8x8xbf16>,
      %c2 = arith.constant 2 : index
      %c0_18 = arith.constant 0 : index
      %c0_19 = arith.constant 0 : index
      %29 = vector.load %arg9[%c2, %c0_18, %c0_19] : memref<4x8x8xf32, #tpu.memory_space<vmem>>, vector<1x8x8xf32>
      %30 = vector.shape_cast %29 : vector<1x8x8xf32> to vector<8x8xf32>
      %c2_20 = arith.constant 2 : index
      %c0_21 = arith.constant 0 : index
      %c0_22 = arith.constant 0 : index
      %31 = vector.load %arg8[%c2_20, %c0_21, %c0_22] : memref<4x8x1xf32, #tpu.memory_space<vmem>>, vector<1x8x1xf32>
      %32 = vector.shape_cast %31 : vector<1x8x1xf32> to vector<8x1xf32>
      %33 = vector.broadcast %32 : vector<8x1xf32> to vector<8x8xf32>
      %34 = arith.divf %30, %33 : vector<8x8xf32>
      %35 = arith.truncf %34 : vector<8x8xf32> to vector<8x8xbf16>
      %c0_23 = arith.constant 0 : index
      %c0_24 = arith.constant 0 : index
      %c16 = arith.constant 16 : index
      %36 = vector.load %arg6[%c0_23, %c0_24, %c16] : memref<1x8x32xbf16, #tpu.memory_space<vmem>>, vector<1x8x8xbf16>
      %37 = vector.shape_cast %36 : vector<1x8x8xbf16> to vector<8x8xbf16>
      %38 = vector.shape_cast %35 : vector<8x8xbf16> to vector<1x8x8xbf16>
      tpu.vector_store %arg6[%c0_23, %c0_24, %c16], %38 {strides = array<i32>} : memref<1x8x32xbf16, #tpu.memory_space<vmem>>, vector<1x8x8xbf16>,
      %c3 = arith.constant 3 : index
      %c0_25 = arith.constant 0 : index
      %c0_26 = arith.constant 0 : index
      %39 = vector.load %arg9[%c3, %c0_25, %c0_26] : memref<4x8x8xf32, #tpu.memory_space<vmem>>, vector<1x8x8xf32>
      %40 = vector.shape_cast %39 : vector<1x8x8xf32> to vector<8x8xf32>
      %c3_27 = arith.constant 3 : index
      %c0_28 = arith.constant 0 : index
      %c0_29 = arith.constant 0 : index
      %41 = vector.load %arg8[%c3_27, %c0_28, %c0_29] : memref<4x8x1xf32, #tpu.memory_space<vmem>>, vector<1x8x1xf32>
      %42 = vector.shape_cast %41 : vector<1x8x1xf32> to vector<8x1xf32>
      %43 = vector.broadcast %42 : vector<8x1xf32> to vector<8x8xf32>
      %44 = arith.divf %40, %43 : vector<8x8xf32>
      %45 = arith.truncf %44 : vector<8x8xf32> to vector<8x8xbf16>
      %c0_30 = arith.constant 0 : index
      %c0_31 = arith.constant 0 : index
      %c24 = arith.constant 24 : index
      %46 = vector.load %arg6[%c0_30, %c0_31, %c24] : memref<1x8x32xbf16, #tpu.memory_space<vmem>>, vector<1x8x8xbf16>
      %47 = vector.shape_cast %46 : vector<1x8x8xbf16> to vector<8x8xbf16>
      %48 = vector.shape_cast %45 : vector<8x8xbf16> to vector<1x8x8xbf16>
      tpu.vector_store %arg6[%c0_30, %c0_31, %c24], %48 {strides = array<i32>} : memref<1x8x32xbf16, #tpu.memory_space<vmem>>, vector<1x8x8xbf16>,
    } else {
    }
    return
  }
  func.func @transform_0(%arg0: i32, %arg1: i32, %arg2: i32) -> (i32, i32, i32, i32) {
    %c0_i32 = arith.constant 0 : i32
    %c0_i32_0 = arith.constant 0 : i32
    %c0_i32_1 = arith.constant 0 : i32
    return %c0_i32, %arg0, %arg1, %c0_i32_0 : i32, i32, i32, i32
  }
  func.func @transform_1(%arg0: i32, %arg1: i32, %arg2: i32) -> (i32, i32, i32, i32) {
    %0 = arith.minsi %arg2, %arg1 : i32
    %c1_i32 = arith.constant 1 : i32
    %c0_i32 = arith.constant 0 : i32
    %c0_i32_0 = arith.constant 0 : i32
    return %c1_i32, %arg0, %0, %c0_i32 : i32, i32, i32, i32
  }
  func.func @transform_2(%arg0: i32, %arg1: i32, %arg2: i32) -> (i32, i32, i32, i32) {
    %0 = arith.minsi %arg2, %arg1 : i32
    %c2_i32 = arith.constant 2 : i32
    %c0_i32 = arith.constant 0 : i32
    %c0_i32_0 = arith.constant 0 : i32
    return %c2_i32, %arg0, %0, %c0_i32 : i32, i32, i32, i32
  }
  func.func @transform_3(%arg0: i32, %arg1: i32, %arg2: i32) -> (i32, i32, i32) {
    %c0_i32 = arith.constant 0 : i32
    %c0_i32_0 = arith.constant 0 : i32
    return %arg0, %arg1, %c0_i32 : i32, i32, i32
  }
}

module attributes {stable_mosaic.version = 11 : i64} {
  func.func @proj_ff_kernel(%arg0: i32, %arg1: i32, %arg2: memref<16x32xbf16, #tpu.memory_space<vmem>>, %arg3: memref<16x32xf32, #tpu.memory_space<vmem>>, %arg4: memref<32x32xbf16, #tpu.memory_space<vmem>>, %arg5: memref<1x32xf32, #tpu.memory_space<vmem>>, %arg6: memref<1x32xf32, #tpu.memory_space<vmem>>, %arg7: memref<1x32xf32, #tpu.memory_space<vmem>>, %arg8: memref<32x128xbf16, #tpu.memory_space<vmem>>, %arg9: memref<1x128xf32, #tpu.memory_space<vmem>>, %arg10: memref<128x32xbf16, #tpu.memory_space<vmem>>, %arg11: memref<1x32xf32, #tpu.memory_space<vmem>>, %arg12: memref<16x32xf32, #tpu.memory_space<vmem>>, %arg13: memref<16x32xf32, #tpu.memory_space<vmem>>, %arg14: memref<16x32xbf16, #tpu.memory_space<vmem>>, %arg15: memref<16x32xf32, #tpu.memory_space<vmem>>) attributes {dimension_semantics = [#tpu.dimension_semantics<parallel>, #tpu.dimension_semantics<arbitrary>], iteration_bounds = array<i64: 1, 1>, scalar_prefetch = 0 : i64, scratch_operands = 3 : i64, tpu.core_type = #tpu.core_type<tc>, window_params = [{transform_indices = @transform_0, window_bounds = array<i64: 16, 32>}, {transform_indices = @transform_1, window_bounds = array<i64: 16, 32>}, {pipeline_mode = #tpu.pipeline_mode<synchronous>, transform_indices = @transform_2, window_bounds = array<i64: 32, 32>}, {pipeline_mode = #tpu.pipeline_mode<synchronous>, transform_indices = @transform_3, window_bounds = array<i64: 1, 32>}, {pipeline_mode = #tpu.pipeline_mode<synchronous>, transform_indices = @transform_4, window_bounds = array<i64: 1, 32>}, {pipeline_mode = #tpu.pipeline_mode<synchronous>, transform_indices = @transform_5, window_bounds = array<i64: 1, 32>}, {transform_indices = @transform_6, window_bounds = array<i64: 32, 128>}, {transform_indices = @transform_7, window_bounds = array<i64: 1, 128>}, {transform_indices = @transform_8, window_bounds = array<i64: 128, 32>}, {pipeline_mode = #tpu.pipeline_mode<synchronous>, transform_indices = @transform_9, window_bounds = array<i64: 1, 32>}, {transform_indices = @transform_10, window_bounds = array<i64: 16, 32>}]} {
    %c0_i32 = arith.constant 0 : i32
    %0 = arith.cmpi eq, %arg1, %c0_i32 : i32
    %1 = arith.extui %0 : i1 to i32
    %c0_i32_0 = arith.constant 0 : i32
    %2 = arith.cmpi ne, %1, %c0_i32_0 : i32
    scf.if %2 {
      %c0_19 = arith.constant 0 : index
      %c0_20 = arith.constant 0 : index
      %31 = vector.load %arg2[%c0_19, %c0_20] : memref<16x32xbf16, #tpu.memory_space<vmem>>, vector<16x32xbf16>
      %c0_21 = arith.constant 0 : index
      %c0_22 = arith.constant 0 : index
      %32 = vector.load %arg4[%c0_21, %c0_22] : memref<32x32xbf16, #tpu.memory_space<vmem>>, vector<32x32xbf16>
      %cst_23 = arith.constant dense<0.000000e+00> : vector<16x32xf32>
      %33 = tpu.matmul %31, %32, %cst_23 {dimension_numbers = #tpu.dot_dimension_numbers<[1], [0], [0], [1], [0, 0, 1, 1], [], []>} : vector<16x32xbf16>, vector<32x32xbf16>, vector<16x32xf32> -> vector<16x32xf32>
      %c0_24 = arith.constant 0 : index
      %c0_25 = arith.constant 0 : index
      %34 = vector.load %arg5[%c0_24, %c0_25] : memref<1x32xf32, #tpu.memory_space<vmem>>, vector<1x32xf32>
      %35 = vector.broadcast %34 : vector<1x32xf32> to vector<16x32xf32>
      %36 = arith.addf %33, %35 : vector<16x32xf32>
      %c0_26 = arith.constant 0 : index
      %c0_27 = arith.constant 0 : index
      %37 = vector.load %arg3[%c0_26, %c0_27] : memref<16x32xf32, #tpu.memory_space<vmem>>, vector<16x32xf32>
      %38 = arith.addf %37, %36 : vector<16x32xf32>
      %c0_28 = arith.constant 0 : index
      %c0_29 = arith.constant 0 : index
      %39 = vector.load %arg13[%c0_28, %c0_29] : memref<16x32xf32, #tpu.memory_space<vmem>>, vector<16x32xf32>
      tpu.vector_store %arg13[%c0_28, %c0_29], %38 {strides = array<i32>} : memref<16x32xf32, #tpu.memory_space<vmem>>, vector<16x32xf32>,
      %c0_30 = arith.constant 0 : index
      %c0_31 = arith.constant 0 : index
      %40 = vector.load %arg6[%c0_30, %c0_31] : memref<1x32xf32, #tpu.memory_space<vmem>>, vector<1x32xf32>
      %c0_32 = arith.constant 0 : index
      %c0_33 = arith.constant 0 : index
      %41 = vector.load %arg7[%c0_32, %c0_33] : memref<1x32xf32, #tpu.memory_space<vmem>>, vector<1x32xf32>
      %cst_34 = arith.constant dense<0.000000e+00> : vector<16xf32>
      %42 = vector.multi_reduction <add>, %38, %cst_34 [1] : vector<16x32xf32> to vector<16xf32>
      %43 = vector.shape_cast %42 : vector<16xf32> to vector<16x1xf32>
      %cst_35 = arith.constant 3.200000e+01 : f32
      %44 = vector.broadcast %cst_35 : f32 to vector<16x1xf32>
      %45 = arith.divf %43, %44 : vector<16x1xf32>
      %46 = vector.broadcast %45 : vector<16x1xf32> to vector<16x32xf32>
      %47 = arith.subf %38, %46 : vector<16x32xf32>
      %48 = arith.mulf %47, %47 : vector<16x32xf32>
      %cst_36 = arith.constant dense<0.000000e+00> : vector<16xf32>
      %49 = vector.multi_reduction <add>, %48, %cst_36 [1] : vector<16x32xf32> to vector<16xf32>
      %50 = vector.shape_cast %49 : vector<16xf32> to vector<16x1xf32>
      %cst_37 = arith.constant 3.200000e+01 : f32
      %51 = vector.broadcast %cst_37 : f32 to vector<16x1xf32>
      %52 = arith.divf %50, %51 : vector<16x1xf32>
      %cst_38 = arith.constant 9.99999974E-6 : f32
      %53 = vector.broadcast %cst_38 : f32 to vector<16x1xf32>
      %54 = arith.addf %52, %53 : vector<16x1xf32>
      %55 = math.rsqrt %54 : vector<16x1xf32>
      %56 = vector.broadcast %55 : vector<16x1xf32> to vector<16x32xf32>
      %57 = arith.mulf %47, %56 : vector<16x32xf32>
      %58 = vector.broadcast %40 : vector<1x32xf32> to vector<16x32xf32>
      %59 = arith.mulf %58, %57 : vector<16x32xf32>
      %60 = vector.broadcast %41 : vector<1x32xf32> to vector<16x32xf32>
      %61 = arith.addf %59, %60 : vector<16x32xf32>
      %62 = arith.truncf %61 : vector<16x32xf32> to vector<16x32xbf16>
      %c0_39 = arith.constant 0 : index
      %c0_40 = arith.constant 0 : index
      %63 = vector.load %arg14[%c0_39, %c0_40] : memref<16x32xbf16, #tpu.memory_space<vmem>>, vector<16x32xbf16>
      tpu.vector_store %arg14[%c0_39, %c0_40], %62 {strides = array<i32>} : memref<16x32xbf16, #tpu.memory_space<vmem>>, vector<16x32xbf16>,
      %cst_41 = arith.constant 0.000000e+00 : f32
      %64 = vector.broadcast %cst_41 : f32 to vector<16x32xf32>
      %c0_42 = arith.constant 0 : index
      %c0_43 = arith.constant 0 : index
      %65 = vector.load %arg15[%c0_42, %c0_43] : memref<16x32xf32, #tpu.memory_space<vmem>>, vector<16x32xf32>
      tpu.vector_store %arg15[%c0_42, %c0_43], %64 {strides = array<i32>} : memref<16x32xf32, #tpu.memory_space<vmem>>, vector<16x32xf32>,
    } else {
    }
    %c0 = arith.constant 0 : index
    %c0_1 = arith.constant 0 : index
    %3 = vector.load %arg14[%c0, %c0_1] : memref<16x32xbf16, #tpu.memory_space<vmem>>, vector<16x32xbf16>
    %c0_2 = arith.constant 0 : index
    %c0_3 = arith.constant 0 : index
    %4 = vector.load %arg8[%c0_2, %c0_3] : memref<32x128xbf16, #tpu.memory_space<vmem>>, vector<32x128xbf16>
    %cst = arith.constant dense<0.000000e+00> : vector<16x128xf32>
    %5 = tpu.matmul %3, %4, %cst {dimension_numbers = #tpu.dot_dimension_numbers<[1], [0], [0], [1], [0, 0, 1, 1], [], []>} : vector<16x32xbf16>, vector<32x128xbf16>, vector<16x128xf32> -> vector<16x128xf32>
    %c0_4 = arith.constant 0 : index
    %c0_5 = arith.constant 0 : index
    %6 = vector.load %arg9[%c0_4, %c0_5] : memref<1x128xf32, #tpu.memory_space<vmem>>, vector<1x128xf32>
    %7 = vector.broadcast %6 : vector<1x128xf32> to vector<16x128xf32>
    %8 = arith.addf %5, %7 : vector<16x128xf32>
    %cst_6 = arith.constant 5.000000e-01 : f32
    %9 = vector.broadcast %cst_6 : f32 to vector<16x128xf32>
    %10 = arith.mulf %9, %8 : vector<16x128xf32>
    %11 = arith.mulf %8, %8 : vector<16x128xf32>
    %12 = arith.mulf %8, %11 : vector<16x128xf32>
    %cst_7 = arith.constant 4.471500e-02 : f32
    %13 = vector.broadcast %cst_7 : f32 to vector<16x128xf32>
    %14 = arith.mulf %13, %12 : vector<16x128xf32>
    %15 = arith.addf %8, %14 : vector<16x128xf32>
    %cst_8 = arith.constant 0.797884583 : f32
    %16 = vector.broadcast %cst_8 : f32 to vector<16x128xf32>
    %17 = arith.mulf %16, %15 : vector<16x128xf32>
    %18 = math.tanh %17 : vector<16x128xf32>
    %cst_9 = arith.constant 1.000000e+00 : f32
    %19 = vector.broadcast %cst_9 : f32 to vector<16x128xf32>
    %20 = arith.addf %19, %18 : vector<16x128xf32>
    %21 = arith.mulf %10, %20 : vector<16x128xf32>
    %c0_10 = arith.constant 0 : index
    %c0_11 = arith.constant 0 : index
    %22 = vector.load %arg15[%c0_10, %c0_11] : memref<16x32xf32, #tpu.memory_space<vmem>>, vector<16x32xf32>
    %23 = arith.truncf %21 : vector<16x128xf32> to vector<16x128xbf16>
    %c0_12 = arith.constant 0 : index
    %c0_13 = arith.constant 0 : index
    %24 = vector.load %arg10[%c0_12, %c0_13] : memref<128x32xbf16, #tpu.memory_space<vmem>>, vector<128x32xbf16>
    %cst_14 = arith.constant dense<0.000000e+00> : vector<16x32xf32>
    %25 = tpu.matmul %23, %24, %cst_14 {dimension_numbers = #tpu.dot_dimension_numbers<[1], [0], [0], [1], [0, 0, 1, 1], [], []>} : vector<16x128xbf16>, vector<128x32xbf16>, vector<16x32xf32> -> vector<16x32xf32>
    %26 = arith.addf %22, %25 : vector<16x32xf32>
    %c0_15 = arith.constant 0 : index
    %c0_16 = arith.constant 0 : index
    %27 = vector.load %arg15[%c0_15, %c0_16] : memref<16x32xf32, #tpu.memory_space<vmem>>, vector<16x32xf32>
    tpu.vector_store %arg15[%c0_15, %c0_16], %26 {strides = array<i32>} : memref<16x32xf32, #tpu.memory_space<vmem>>, vector<16x32xf32>,
    %c0_i32_17 = arith.constant 0 : i32
    %28 = arith.cmpi eq, %arg1, %c0_i32_17 : i32
    %29 = arith.extui %28 : i1 to i32
    %c0_i32_18 = arith.constant 0 : i32
    %30 = arith.cmpi ne, %29, %c0_i32_18 : i32
    scf.if %30 {
      %c0_19 = arith.constant 0 : index
      %c0_20 = arith.constant 0 : index
      %31 = vector.load %arg13[%c0_19, %c0_20] : memref<16x32xf32, #tpu.memory_space<vmem>>, vector<16x32xf32>
      %c0_21 = arith.constant 0 : index
      %c0_22 = arith.constant 0 : index
      %32 = vector.load %arg15[%c0_21, %c0_22] : memref<16x32xf32, #tpu.memory_space<vmem>>, vector<16x32xf32>
      %33 = arith.addf %31, %32 : vector<16x32xf32>
      %c0_23 = arith.constant 0 : index
      %c0_24 = arith.constant 0 : index
      %34 = vector.load %arg11[%c0_23, %c0_24] : memref<1x32xf32, #tpu.memory_space<vmem>>, vector<1x32xf32>
      %35 = vector.broadcast %34 : vector<1x32xf32> to vector<16x32xf32>
      %36 = arith.addf %33, %35 : vector<16x32xf32>
      %c0_25 = arith.constant 0 : index
      %c0_26 = arith.constant 0 : index
      %37 = vector.load %arg12[%c0_25, %c0_26] : memref<16x32xf32, #tpu.memory_space<vmem>>, vector<16x32xf32>
      tpu.vector_store %arg12[%c0_25, %c0_26], %36 {strides = array<i32>} : memref<16x32xf32, #tpu.memory_space<vmem>>, vector<16x32xf32>,
    } else {
    }
    return
  }
  func.func @transform_0(%arg0: i32, %arg1: i32) -> (i32, i32) {
    %c0_i32 = arith.constant 0 : i32
    %c0_i32_0 = arith.constant 0 : i32
    return %arg0, %c0_i32 : i32, i32
  }
  func.func @transform_1(%arg0: i32, %arg1: i32) -> (i32, i32) {
    %c0_i32 = arith.constant 0 : i32
    %c0_i32_0 = arith.constant 0 : i32
    return %arg0, %c0_i32 : i32, i32
  }
  func.func @transform_2(%arg0: i32, %arg1: i32) -> (i32, i32) {
    %c0_i32 = arith.constant 0 : i32
    %c0_i32_0 = arith.constant 0 : i32
    %c0_i32_1 = arith.constant 0 : i32
    return %c0_i32, %c0_i32_0 : i32, i32
  }
  func.func @transform_3(%arg0: i32, %arg1: i32) -> (i32, i32) {
    %c0_i32 = arith.constant 0 : i32
    %c0_i32_0 = arith.constant 0 : i32
    %c0_i32_1 = arith.constant 0 : i32
    return %c0_i32, %c0_i32_0 : i32, i32
  }
  func.func @transform_4(%arg0: i32, %arg1: i32) -> (i32, i32) {
    %c0_i32 = arith.constant 0 : i32
    %c0_i32_0 = arith.constant 0 : i32
    %c0_i32_1 = arith.constant 0 : i32
    return %c0_i32, %c0_i32_0 : i32, i32
  }
  func.func @transform_5(%arg0: i32, %arg1: i32) -> (i32, i32) {
    %c0_i32 = arith.constant 0 : i32
    %c0_i32_0 = arith.constant 0 : i32
    %c0_i32_1 = arith.constant 0 : i32
    return %c0_i32, %c0_i32_0 : i32, i32
  }
  func.func @transform_6(%arg0: i32, %arg1: i32) -> (i32, i32) {
    %c0_i32 = arith.constant 0 : i32
    %c0_i32_0 = arith.constant 0 : i32
    return %c0_i32, %arg1 : i32, i32
  }
  func.func @transform_7(%arg0: i32, %arg1: i32) -> (i32, i32) {
    %c0_i32 = arith.constant 0 : i32
    %c0_i32_0 = arith.constant 0 : i32
    return %c0_i32, %arg1 : i32, i32
  }
  func.func @transform_8(%arg0: i32, %arg1: i32) -> (i32, i32) {
    %c0_i32 = arith.constant 0 : i32
    %c0_i32_0 = arith.constant 0 : i32
    return %arg1, %c0_i32 : i32, i32
  }
  func.func @transform_9(%arg0: i32, %arg1: i32) -> (i32, i32) {
    %c0_i32 = arith.constant 0 : i32
    %c0_i32_0 = arith.constant 0 : i32
    %c0_i32_1 = arith.constant 0 : i32
    return %c0_i32, %c0_i32_0 : i32, i32
  }
  func.func @transform_10(%arg0: i32, %arg1: i32) -> (i32, i32) {
    %c0_i32 = arith.constant 0 : i32
    %c0_i32_0 = arith.constant 0 : i32
    return %arg0, %c0_i32 : i32, i32
  }
}

module attributes {stable_mosaic.version = 11 : i64} {
  func.func @final_ln_kernel(%arg0: i32, %arg1: memref<16x32xf32, #tpu.memory_space<vmem>>, %arg2: memref<1x32xf32, #tpu.memory_space<vmem>>, %arg3: memref<1x32xf32, #tpu.memory_space<vmem>>, %arg4: memref<16x32xbf16, #tpu.memory_space<vmem>>) attributes {dimension_semantics = [#tpu.dimension_semantics<parallel>], iteration_bounds = array<i64: 1>, scalar_prefetch = 0 : i64, scratch_operands = 0 : i64, tpu.core_type = #tpu.core_type<tc>, window_params = [{transform_indices = @transform_0, window_bounds = array<i64: 16, 32>}, {pipeline_mode = #tpu.pipeline_mode<synchronous>, transform_indices = @transform_1, window_bounds = array<i64: 1, 32>}, {pipeline_mode = #tpu.pipeline_mode<synchronous>, transform_indices = @transform_2, window_bounds = array<i64: 1, 32>}, {transform_indices = @transform_3, window_bounds = array<i64: 16, 32>}]} {
    %c0 = arith.constant 0 : index
    %c0_0 = arith.constant 0 : index
    %0 = vector.load %arg1[%c0, %c0_0] : memref<16x32xf32, #tpu.memory_space<vmem>>, vector<16x32xf32>
    %c0_1 = arith.constant 0 : index
    %c0_2 = arith.constant 0 : index
    %1 = vector.load %arg2[%c0_1, %c0_2] : memref<1x32xf32, #tpu.memory_space<vmem>>, vector<1x32xf32>
    %c0_3 = arith.constant 0 : index
    %c0_4 = arith.constant 0 : index
    %2 = vector.load %arg3[%c0_3, %c0_4] : memref<1x32xf32, #tpu.memory_space<vmem>>, vector<1x32xf32>
    %cst = arith.constant dense<0.000000e+00> : vector<16xf32>
    %3 = vector.multi_reduction <add>, %0, %cst [1] : vector<16x32xf32> to vector<16xf32>
    %4 = vector.shape_cast %3 : vector<16xf32> to vector<16x1xf32>
    %cst_5 = arith.constant 3.200000e+01 : f32
    %5 = vector.broadcast %cst_5 : f32 to vector<16x1xf32>
    %6 = arith.divf %4, %5 : vector<16x1xf32>
    %7 = vector.broadcast %6 : vector<16x1xf32> to vector<16x32xf32>
    %8 = arith.subf %0, %7 : vector<16x32xf32>
    %9 = arith.mulf %8, %8 : vector<16x32xf32>
    %cst_6 = arith.constant dense<0.000000e+00> : vector<16xf32>
    %10 = vector.multi_reduction <add>, %9, %cst_6 [1] : vector<16x32xf32> to vector<16xf32>
    %11 = vector.shape_cast %10 : vector<16xf32> to vector<16x1xf32>
    %cst_7 = arith.constant 3.200000e+01 : f32
    %12 = vector.broadcast %cst_7 : f32 to vector<16x1xf32>
    %13 = arith.divf %11, %12 : vector<16x1xf32>
    %cst_8 = arith.constant 9.99999974E-6 : f32
    %14 = vector.broadcast %cst_8 : f32 to vector<16x1xf32>
    %15 = arith.addf %13, %14 : vector<16x1xf32>
    %16 = math.rsqrt %15 : vector<16x1xf32>
    %17 = vector.broadcast %16 : vector<16x1xf32> to vector<16x32xf32>
    %18 = arith.mulf %8, %17 : vector<16x32xf32>
    %19 = vector.broadcast %1 : vector<1x32xf32> to vector<16x32xf32>
    %20 = arith.mulf %19, %18 : vector<16x32xf32>
    %21 = vector.broadcast %2 : vector<1x32xf32> to vector<16x32xf32>
    %22 = arith.addf %20, %21 : vector<16x32xf32>
    %23 = arith.truncf %22 : vector<16x32xf32> to vector<16x32xbf16>
    %c0_9 = arith.constant 0 : index
    %c0_10 = arith.constant 0 : index
    %24 = vector.load %arg4[%c0_9, %c0_10] : memref<16x32xbf16, #tpu.memory_space<vmem>>, vector<16x32xbf16>
    tpu.vector_store %arg4[%c0_9, %c0_10], %23 {strides = array<i32>} : memref<16x32xbf16, #tpu.memory_space<vmem>>, vector<16x32xbf16>,
    return
  }
  func.func @transform_0(%arg0: i32) -> (i32, i32) {
    %c0_i32 = arith.constant 0 : i32
    %c0_i32_0 = arith.constant 0 : i32
    return %arg0, %c0_i32 : i32, i32
  }
  func.func @transform_1(%arg0: i32) -> (i32, i32) {
    %c0_i32 = arith.constant 0 : i32
    %c0_i32_0 = arith.constant 0 : i32
    %c0_i32_1 = arith.constant 0 : i32
    return %c0_i32, %c0_i32_0 : i32, i32
  }
  func.func @transform_2(%arg0: i32) -> (i32, i32) {
    %c0_i32 = arith.constant 0 : i32
    %c0_i32_0 = arith.constant 0 : i32
    %c0_i32_1 = arith.constant 0 : i32
    return %c0_i32, %c0_i32_0 : i32, i32
  }
  func.func @transform_3(%arg0: i32) -> (i32, i32) {
    %c0_i32 = arith.constant 0 : i32
    %c0_i32_0 = arith.constant 0 : i32
    return %arg0, %c0_i32 : i32, i32
  }
}

module attributes {stable_mosaic.version = 11 : i64} {
  func.func @lm_head_kernel(%arg0: i32, %arg1: i32, %arg2: memref<16x32xbf16, #tpu.memory_space<vmem>>, %arg3: memref<32x256xbf16, #tpu.memory_space<vmem>>, %arg4: memref<16x256xf32, #tpu.memory_space<vmem>>) attributes {dimension_semantics = [#tpu.dimension_semantics<parallel>, #tpu.dimension_semantics<parallel>], iteration_bounds = array<i64: 1, 1>, scalar_prefetch = 0 : i64, scratch_operands = 0 : i64, tpu.core_type = #tpu.core_type<tc>, window_params = [{transform_indices = @transform_0, window_bounds = array<i64: 16, 32>}, {transform_indices = @transform_1, window_bounds = array<i64: 32, 256>}, {transform_indices = @transform_2, window_bounds = array<i64: 16, 256>}]} {
    %c0 = arith.constant 0 : index
    %c0_0 = arith.constant 0 : index
    %0 = vector.load %arg2[%c0, %c0_0] : memref<16x32xbf16, #tpu.memory_space<vmem>>, vector<16x32xbf16>
    %c0_1 = arith.constant 0 : index
    %c0_2 = arith.constant 0 : index
    %1 = vector.load %arg3[%c0_1, %c0_2] : memref<32x256xbf16, #tpu.memory_space<vmem>>, vector<32x256xbf16>
    %cst = arith.constant dense<0.000000e+00> : vector<16x256xf32>
    %2 = tpu.matmul %0, %1, %cst {dimension_numbers = #tpu.dot_dimension_numbers<[1], [0], [0], [1], [0, 0, 1, 1], [], []>} : vector<16x32xbf16>, vector<32x256xbf16>, vector<16x256xf32> -> vector<16x256xf32>
    %c0_3 = arith.constant 0 : index
    %c0_4 = arith.constant 0 : index
    %3 = vector.load %arg4[%c0_3, %c0_4] : memref<16x256xf32, #tpu.memory_space<vmem>>, vector<16x256xf32>
    tpu.vector_store %arg4[%c0_3, %c0_4], %2 {strides = array<i32>} : memref<16x256xf32, #tpu.memory_space<vmem>>, vector<16x256xf32>,
    return
  }
  func.func @transform_0(%arg0: i32, %arg1: i32) -> (i32, i32) {
    %c0_i32 = arith.constant 0 : i32
    %c0_i32_0 = arith.constant 0 : i32
    return %arg1, %c0_i32 : i32, i32
  }
  func.func @transform_1(%arg0: i32, %arg1: i32) -> (i32, i32) {
    %c0_i32 = arith.constant 0 : i32
    %c0_i32_0 = arith.constant 0 : i32
    return %c0_i32, %arg0 : i32, i32
  }
  func.func @transform_2(%arg0: i32, %arg1: i32) -> (i32, i32) {
    %c0_i32 = arith.constant 0 : i32
    return %arg1, %arg0 : i32, i32
  }
}

</mosaic_0001>

<bundles_post_ra>
// kernel: gpt_forward.14
= control target key start
LH: loop header
LB: loop body
LE: loop exit
PB: predicated region body
PF: predicated region fallthrough
CT: control target
= control target key end

     0   :  { %vm18_vm0 = vcmask 261120   ;;  %v98_v4 = vmov 32.0   ;;  %vm82_vm6 = vcmask 257024   ;;  %s141_s0 = inlined_call_operand.vmem [shape: f32[16,32], index: 0, kind: input, shape index: {}]   ;;  %s142_s1 = inlined_call_operand.vmem [shape: f32[1,32], index: 1, kind: input, shape index: {}]   ;;  %s143_s2 = inlined_call_operand.vmem [shape: f32[1,32], index: 2, kind: input, shape index: {}]   ;;  %s144_s3 = inlined_call_operand.vmem [shape: bf16[16,32], index: 3, kind: output, shape index: {}]  }
   0x1   :  { %v14_v0 = vld [vmem:[%s141_s0] sm:$0xff]  ;;  %v15_v2 = vld [vmem:[%s141_s0 + $0x8] sm:$0xff]  ;;  %92 = vrcp.f32 %v98_v4 }
   0x2   :  { %v19_v1 = vsel %vm18_vm0, %v14_v0, 0.0  ;;  %v22_v3 = vsel %vm18_vm0, %v15_v2, 0.0  ;;  %v90_v35 = vld [vmem:[%s142_s1] ss:$0 sm:$0xff] }
   0x3   :  { %20 = vadd.xlane.f32.xlu0 %v19_v1  ;;  %v91_v38 = vld [vmem:[%s143_s2] ss:$0 sm:$0xff] }
   0x7   :  { %v93_v5 = vpop.eup %92 }
   0x8   :  { %v26_v6 = vmul.f32 32.0, %v93_v5  ;;  %vm30_vm1 = vweird.f32 %v93_v5 }
   0xa   :  { %v27_v7 = vsub.f32 1.0, %v26_v6 }
   0xb   :  { %23 = vadd.xlane.f32.xlu0 %v22_v3 }
   0xc   :  { %v28_v8 = vmul.f32 %v93_v5, %v27_v7 }
   0xe   :  { %v29_v9 = vadd.f32 %v93_v5, %v28_v8 }
  0x10   :  { %v31_v10 = vsel %vm30_vm1, %v93_v5, %v29_v9 }
  0x76   :  { %v21_v11 = vpop.xlane.xlu0 %20 }
  0x77   :  { %v32_v12 = vmul.f32 %v31_v10, %v21_v11 }
  0x79   :  { %v34_v13 = vsub.f32 %v14_v0, %v32_v12 }
  0x7b   :  { %v36_v14 = vmul.f32 %v34_v13, %v34_v13 }
  0x7d   :  { %v38_v15 = vsel %vm18_vm0, %v36_v14, 0.0 }
  0x7e   :  { %39 = vadd.xlane.f32.xlu1 %v38_v15  ;;  %v24_v16 = vpop.xlane.xlu0 %23 }
  0x7f   :  { %v33_v17 = vmul.f32 %v31_v10, %v24_v16 }
  0x81   :  { %v35_v18 = vsub.f32 %v15_v2, %v33_v17 }
  0x83   :  { %v37_v19 = vmul.f32 %v35_v18, %v35_v18 }
  0x85   :  { %v41_v20 = vsel %vm18_vm0, %v37_v19, 0.0 }
  0x86   :  { %42 = vadd.xlane.f32.xlu1 %v41_v20 }
  0xf1   :  { %v40_v21 = vpop.xlane.xlu1 %39 }
  0xf2   :  { %v44_v22 = vmul.f32 %v40_v21, %v31_v10 }
  0xf4   :  { %v46_v23 = vadd.f32 1e-05, %v44_v22 }
  0xf6   :  { %94 = vrsqrt.f32 %v46_v23  ;;  %vm54_vm3 = vweird.f32 %v46_v23 }
  0xf9   :  { %v43_v24 = vpop.xlane.xlu1 %42 }
  0xfa   :  { %v45_v25 = vmul.f32 %v43_v24, %v31_v10 }
  0xfc   :  { %v95_v26 = vpop.eup %94  ;;  %v47_v27 = vadd.f32 1e-05, %v45_v25 }
  0xfd   :  { %v49_v28 = vmul.f32 %v95_v26, %v46_v23  ;;  %vm55_vm2 = vweird.f32 %v95_v26 }
  0xfe   :  { %96 = vrsqrt.f32 %v47_v27  ;;  %vm56_vm4 = vmor %vm54_vm3, %vm55_vm2  ;;  %vm64_vm7 = vweird.f32 %v47_v27 }
  0xff   :  { %v50_v29 = vmul.f32 %v95_v26, %v49_v28 }
 0x101   :  { %v51_v30 = vmul.f32 0.5, %v50_v29 }
 0x103   :  { %v52_v31 = vsub.f32 1.5, %v51_v30 }
 0x104   :  { %v97_v32 = vpop.eup %96 }
 0x105   :  { %v53_v33 = vmul.f32 %v95_v26, %v52_v31  ;;  %v59_v34 = vmul.f32 %v97_v32, %v47_v27  ;;  %vm65_vm5 = vweird.f32 %v97_v32 }
 0x106   :  { %vm66_vm8 = vmor %vm64_vm7, %vm65_vm5 }
 0x107   :  { %v57_v36 = vsel %vm56_vm4, %v95_v26, %v53_v33  ;;  %v60_v37 = vmul.f32 %v97_v32, %v59_v34 }
 0x108   :  { %v68_v39 = vmul.f32 %v57_v36, %v34_v13 }
 0x109   :  { %v61_v40 = vmul.f32 0.5, %v60_v37 }
 0x10a   :  { %v73_v41 = vmul.f32 %v90_v35, %v68_v39 }
 0x10b   :  { %v62_v42 = vsub.f32 1.5, %v61_v40 }
 0x10c   :  { %v78_v43 = vadd.f32 %v91_v38, %v73_v41 }
 0x10d   :  { %v63_v44 = vmul.f32 %v97_v32, %v62_v42 }
 0x10e   :  { %v80_v45 = vpack.c.bf16 %v78_v43, %v78_v43 }
 0x10f   :  { %v67_v46 = vsel %vm66_vm8, %v97_v32, %v63_v44 }
 0x110   :  { %83 = vst.msk [vmem:[%s144_s3] sm:$0xf] %vm82_vm6, %v80_v45  ;;  %v69_v47 = vmul.f32 %v67_v46, %v35_v18 }
 0x112   :  { %v74_v48 = vmul.f32 %v90_v35, %v69_v47 }
 0x114   :  { %v79_v49 = vadd.f32 %v91_v38, %v74_v48 }
 0x116   :  { %v81_v50 = vpack.c.bf16 %v79_v49, %v79_v49 }
 0x118   :  { %84 = vst.msk [vmem:[%s144_s3 + $0x4] sm:$0xf] %vm82_vm6, %v81_v50 }

// kernel: gpt_forward.8
= control target key start
LH: loop header
LB: loop body
LE: loop exit
PB: predicated region body
PF: predicated region fallthrough
CT: control target
= control target key end

     0   :  { %s553_s15 = smov 0   ;;  %s555_s16 = smov 0   ;;  %s611_s0 = inlined_call_operand.vmem [shape: f32[16,32], index: 0, kind: input, shape index: {}]   ;;  %s612_s1 = inlined_call_operand.vmem [shape: f32[1,32], index: 1, kind: input, shape index: {}]   ;;  %s613_s2 = inlined_call_operand.vmem [shape: f32[1,32], index: 2, kind: input, shape index: {}]   ;;  %s614_s3 = inlined_call_operand.vmem [shape: bf16[3,32,32], index: 3, kind: input, shape index: {}]   ;;  %s615_s4 = inlined_call_operand.vmem [shape: bf16[3,16,32], index: 4, kind: output, shape index: {}]  }
   0x1   :  { %s557_s17 = smov 0  }
   0x2 LB: > { %s26_s18 = sadd.s32 1, %s521_s16  ;;  %p450_p0 = scmp.ge.s32.totalorder %s525_s17, 1  ;;  %s525_s17 = sphi %s557_s17, %s14_s17   ;;  %s521_s16 = sphi %s555_s16, %s617_s16   ;;  %s517_s15 = sphi %s553_s15, %s616_s15  }
   0x3   : > { %p28_p1 = scmp.ge.s32.totalorder %s26_s18, 3  ;;  %p187_p2 = scmp.lt.s32.totalorder %s525_s17, 4 }
   0x5   : > { %s619_s18 = smov (%p28_p1, %s26_s18), 0  ;;  %p188_p3 = pnand %p450_p0, %p187_p2 }
   0x6   : > { %p228_p4 = scmp.lt.s32.totalorder (!%p188_p3), %s517_s15, 2 }
   0x7   : > { %191 = sbr.rel (%p188_p3) target bundleno = 428 (0x1ac), region = 36 }
   0xc   : > { %v244_v0 = vld [vmem:[%s611_s0] sm:$0xff]  ;;  %vm248_vm0 = vcmask 261120   ;;  %v245_v2 = vld [vmem:[%s611_s0 + $0x8] sm:$0xff]  ;;  %v527_v4 = vmov 32.0   ;;  %s621_s15 = smov (!%p228_p4, %s517_s15), 2  ;;  %vm346_vm8 = vcmask 257024  }
   0xd   : > { %v249_v1 = vsel %vm248_vm0, %v244_v0, 0.0  ;;  %v252_v3 = vsel %vm248_vm0, %v245_v2, 0.0  ;;  %497 = vrcp.f32 %v527_v4  ;;  %s466_s23 = sshll.u32 %s621_s15, 4  ;;  %v495_v42 = vld [vmem:[%s612_s1] ss:$0 sm:$0xff]  ;;  %s467_s5 = sshll.u32 %s621_s15, 3 }
   0xe   : > { %250 = vadd.xlane.f32.xlu0 %v249_v1  ;;  %s232_s26 = scalar_lea.vmem %s614_s3, %s466_s23  ;;  %v496_v47 = vld [vmem:[%s613_s2] ss:$0 sm:$0xff]  ;;  %s241_s8 = scalar_lea.vmem %s615_s4, %s467_s5 }
   0xf   : > { %v469_v21 = vld [vmem:[%s232_s26 + $0x8] sm:$0xff]  ;;  %v468_v23 = vld [vmem:[%s232_s26] sm:$0xff] }
  0x10   : > { %336 = vmatpush.bf16.msra.mxu0 %v469_v21 }
  0x13   : > { %v498_v5 = vpop.eup %497 }
  0x14   : > { %v256_v6 = vmul.f32 32.0, %v498_v5  ;;  %vm260_vm1 = vweird.f32 %v498_v5  ;;  %337 = vmatpush.bf16.msra.mxu0 %v468_v23 }
  0x16   : > { %253 = vadd.xlane.f32.xlu0 %v252_v3  ;;  %v257_v7 = vsub.f32 1.0, %v256_v6 }
  0x18   : > { %v258_v8 = vmul.f32 %v498_v5, %v257_v7 }
  0x1a   : > { %v259_v9 = vadd.f32 %v498_v5, %v258_v8 }
  0x1c   : > { %v261_v10 = vsel %vm260_vm1, %v498_v5, %v259_v9 }
  0x81   : > { %v251_v11 = vpop.xlane.xlu0 %250 }
  0x82   : > { %v262_v12 = vmul.f32 %v261_v10, %v251_v11 }
  0x84   : > { %v264_v13 = vsub.f32 %v244_v0, %v262_v12 }
  0x86   : > { %v266_v14 = vmul.f32 %v264_v13, %v264_v13 }
  0x88   : > { %v268_v15 = vsel %vm248_vm0, %v266_v14, 0.0 }
  0x89   : > { %269 = vadd.xlane.f32.xlu1 %v268_v15  ;;  %v254_v16 = vpop.xlane.xlu0 %253 }
  0x8a   : > { %v263_v17 = vmul.f32 %v261_v10, %v254_v16 }
  0x8c   : > { %v265_v18 = vsub.f32 %v245_v2, %v263_v17 }
  0x8e   : > { %v267_v19 = vmul.f32 %v265_v18, %v265_v18 }
  0x90   : > { %v271_v20 = vsel %vm248_vm0, %v267_v19, 0.0 }
  0x91   : > { %272 = vadd.xlane.f32.xlu1 %v271_v20 }
  0xfc   : > { %v270_v22 = vpop.xlane.xlu1 %269 }
  0xfd   : > { %v274_v24 = vmul.f32 %v270_v22, %v261_v10 }
  0xff   : > { %v276_v25 = vadd.f32 1e-05, %v274_v24 }
 0x101   : > { %499 = vrsqrt.f32 %v276_v25  ;;  %vm284_vm3 = vweird.f32 %v276_v25 }
 0x104   : > { %v273_v26 = vpop.xlane.xlu1 %272 }
 0x105   : > { %v275_v27 = vmul.f32 %v273_v26, %v261_v10 }
 0x107   : > { %v500_v28 = vpop.eup %499  ;;  %v277_v29 = vadd.f32 1e-05, %v275_v27 }
 0x108   : > { %v279_v30 = vmul.f32 %v500_v28, %v276_v25  ;;  %vm285_vm2 = vweird.f32 %v500_v28 }
 0x109   : > { %501 = vrsqrt.f32 %v277_v29  ;;  %vm286_vm4 = vmor %vm284_vm3, %vm285_vm2  ;;  %vm294_vm6 = vweird.f32 %v277_v29 }
 0x10a   : > { %v280_v31 = vmul.f32 %v500_v28, %v279_v30 }
 0x10c   : > { %v281_v32 = vmul.f32 0.5, %v280_v31 }
 0x10e   : > { %v282_v33 = vsub.f32 1.5, %v281_v32 }
 0x10f   : > { %v502_v34 = vpop.eup %501 }
 0x110   : > { %v283_v35 = vmul.f32 %v500_v28, %v282_v33  ;;  %v289_v36 = vmul.f32 %v502_v34, %v277_v29  ;;  %vm295_vm5 = vweird.f32 %v502_v34 }
 0x111   : > { %vm296_vm7 = vmor %vm294_vm6, %vm295_vm5 }
 0x112   : > { %v290_v37 = vmul.f32 %v502_v34, %v289_v36  ;;  %v287_v38 = vsel %vm286_vm4, %v500_v28, %v283_v35 }
 0x113   : > { %v298_v41 = vmul.f32 %v287_v38, %v264_v13 }
 0x114   : > { %v291_v39 = vmul.f32 0.5, %v290_v37 }
 0x115   : > { %v303_v46 = vmul.f32 %v495_v42, %v298_v41 }
 0x116   : > { %v292_v40 = vsub.f32 1.5, %v291_v39 }
 0x117   : > { %v308_v49 = vadd.f32 %v496_v47, %v303_v46 }
 0x118   : > { %v293_v43 = vmul.f32 %v502_v34, %v292_v40 }
 0x11a   : > { %v297_v44 = vsel %vm296_vm7, %v502_v34, %v293_v43 }
 0x11b   : > { %v299_v45 = vmul.f32 %v297_v44, %v265_v18 }
 0x11d   : > { %v304_v48 = vmul.f32 %v495_v42, %v299_v45 }
 0x11f   : > { %v309_v50 = vadd.f32 %v496_v47, %v304_v48 }
 0x121   : > { %v310_v51 = vpack.c.bf16 %v309_v50, %v308_v49 }
 0x123   : > { %463 = vmatmul.msk.bf16.vlgmr.msra.gmra.mxu0 %vm248_vm0, %v310_v51 }
 0x1a0   : > { %v339_v52 = vpop.f32.mrf.mxu0 }
 0x1a1   : > { %v344_v53 = vpack.c.bf16 %v339_v52, %v339_v52 }
 0x1a3   : > { %347 = vst.msk [vmem:[%s241_s8] sm:$0xf] %vm346_vm8, %v344_v53 }
 0x1a8   : > { %v341_v54 = vpop.f32.mrf.mxu0 }
 0x1a9   : > { %v345_v55 = vpack.c.bf16 %v341_v54, %v341_v54 }
 0x1ab   : > { %348 = vst.msk [vmem:[%s241_s8 + $0x4] sm:$0xf] %vm346_vm8, %v345_v55 }
 0x1ac PF: > { %s14_s17 = sadd.s32 1, %s525_s17   ;;  %s616_s15 = smov %s521_s16 }
 0x1ad   : > { %p11_p5 = scmp.ge.s32.totalorder %s14_s17, 5   ;;  %s617_s16 = smov %s619_s18 }
 0x1af   :  { %13 = sbr.rel (!%p11_p5) target bundleno = 2 (0x2), region = 69 }

// kernel: gpt_forward.10
= control target key start
LH: loop header
LB: loop body
LE: loop exit
PB: predicated region body
PF: predicated region fallthrough
CT: control target
= control target key end

     0   :  { %vm67_vm0 = vcmask 261120   ;;  %v419_v14 = vmov 32.0   ;;  %vm156_vm6 = vcmask 257024   ;;  %s556_s2 = inlined_call_operand.vmem [shape: bf16[32,32], index: 2, kind: input, shape index: {}]   ;;  %s557_s3 = inlined_call_operand.vmem [shape: f32[1,32], index: 3, kind: input, shape index: {}]   ;;  %s558_s0 = inlined_call_operand.vmem [shape: bf16[16,32], index: 0, kind: input, shape index: {}]   ;;  %s559_s1 = inlined_call_operand.vmem [shape: f32[16,32], index: 1, kind: input, shape index: {}, may-alias: {1,10}]   ;;  %s560_s4 = inlined_call_operand.vmem [shape: f32[1,32], index: 4, kind: input, shape index: {}]   ;;  %s561_s5 = inlined_call_operand.vmem [shape: f32[1,32], index: 5, kind: input, shape index: {}]   ;;  %s562_s7 = inlined_call_operand.vmem [shape: f32[1,128], index: 7, kind: input, shape index: {}]   ;;  %s563_s6 = inlined_call_operand.vmem [shape: bf16[32,128], index: 6, kind: input, shape index: {}]   ;;  %s564_s9 = inlined_call_operand.vmem [shape: f32[1,32], index: 9, kind: input, shape index: {}]   ;;  %s565_s8 = inlined_call_operand.vmem [shape: bf16[128,32], index: 8, kind: input, shape index: {}]   ;;  %s566_s10 = inlined_call_operand.vmem [shape: f32[16,32], index: 10, kind: output, shape index: {}, may-alias: {1,10}]  }
   0x1   :  { %v390_v0 = vld [vmem:[%s556_s2 + $0x8] sm:$0xff]  ;;  %v389_v1 = vld [vmem:[%s556_s2] sm:$0xff]  ;;  %409 = vrcp.f32 %v419_v14 }
   0x2   :  { %77 = vmatpush.bf16.msra.mxu0 %v390_v0  ;;  %v388_v2 = vld [vmem:[%s558_s0] sm:$0xff]  ;;  %v86_v10 = vld [vmem:[%s559_s1 + $0x8] sm:$0xff]  ;;  %v401_v0 = vld [vmem:[%s565_s8 + $0x38] sm:$0xff] }
   0x3   :  { %v404_v3 = vld [vmem:[%s557_s3] ss:$0 sm:$0xff]  ;;  %v393_v34 = vld [vmem:[%s563_s6 + $0x8] sm:$0xff]  ;;  %291 = vmatpush.bf16.msra.mxu2 %v401_v0 }
   0x4   :  { %v85_v5 = vld [vmem:[%s559_s1] sm:$0xff]  ;;  %198 = vmatpush.bf16.msra.mxu1 %v393_v34 }
   0x5   :  { %v392_v37 = vld [vmem:[%s563_s6] sm:$0xff] }
   0x6   :  { %78 = vmatpush.bf16.msra.mxu0 %v389_v1  ;;  %v405_v47 = vld [vmem:[%s560_s4] ss:$0 sm:$0xff]  ;;  %v400_v1 = vld [vmem:[%s565_s8 + $0x30] sm:$0xff] }
   0x7   :  { %v410_v15 = vpop.eup %409  ;;  %v406_v50 = vld [vmem:[%s561_s5] ss:$0 sm:$0xff]  ;;  %292 = vmatpush.bf16.msra.mxu2 %v400_v1 }
   0x8   :  { %v100_v16 = vmul.f32 32.0, %v410_v15  ;;  %vm104_vm1 = vweird.f32 %v410_v15  ;;  %199 = vmatpush.bf16.msra.mxu1 %v392_v37 }
   0x9   :  { %342 = vmatmul.msk.bf16.vlgmr.msra.gmra.mxu0 %vm67_vm0, %v388_v2  ;;  %v399_v2 = vld [vmem:[%s565_s8 + $0x28] sm:$0xff] }
   0xa   :  { %v101_v17 = vsub.f32 1.0, %v100_v16 }
   0xb   :  { %293 = vmatpush.bf16.msra.mxu2 %v399_v2 }
   0xc   :  { %v102_v18 = vmul.f32 %v410_v15, %v101_v17 }
   0xe   :  { %v103_v19 = vadd.f32 %v410_v15, %v102_v18 }
  0x10   :  { %v105_v20 = vsel %vm104_vm1, %v410_v15, %v103_v19 }
  0x86   :  { %v80_v4 = vpop.f32.mrf.mxu0 }
  0x87   :  { %v81_v6 = vadd.f32 %v404_v3, %v80_v4  ;;  %v397_v4 = vld [vmem:[%s565_s8 + $0x18] sm:$0xff] }
  0x89   :  { %v87_v7 = vadd.f32 %v85_v5, %v81_v6  ;;  %v396_v5 = vld [vmem:[%s565_s8 + $0x10] sm:$0xff]  ;;  %v395_v6 = vld [vmem:[%s565_s8 + $0x8] sm:$0xff] }
  0x8b   :  { %89 = vst.msk [vmem:[#allocation2] sm:$0xff] %vm67_vm0, %v87_v7  ;;  %v93_v8 = vsel %vm67_vm0, %v87_v7, 0.0 }
  0x8c   :  { %94 = vadd.xlane.f32.xlu0 %v93_v8  ;;  %v407_v8 = vld [vmem:[%s562_s7] ss:$0 sm:$0xff] }
  0x8e   :  { %v82_v9 = vpop.f32.mrf.mxu0 }
  0x8f   :  { %v83_v11 = vadd.f32 %v404_v3, %v82_v9  ;;  %v398_v3 = vld [vmem:[%s565_s8 + $0x20] sm:$0xff] }
  0x90   :  { %294 = vmatpush.bf16.msra.mxu2 %v398_v3 }
  0x91   :  { %v88_v12 = vadd.f32 %v86_v10, %v83_v11 }
  0x93   :  { %90 = vst.msk [vmem:[#allocation2 + $0x8] sm:$0xff] %vm67_vm0, %v88_v12  ;;  %v96_v13 = vsel %vm67_vm0, %v88_v12, 0.0 }
  0x94   :  { %97 = vadd.xlane.f32.xlu0 %v96_v13  ;;  %295 = vmatpush.bf16.msra.mxu2 %v397_v4 }
  0x98   :  { %296 = vmatpush.bf16.msra.mxu2 %v396_v5 }
  0x9c   :  { %297 = vmatpush.bf16.msra.mxu2 %v395_v6 }
  0xff   :  { %v95_v21 = vpop.xlane.xlu0 %94 }
 0x100   :  { %v106_v22 = vmul.f32 %v105_v20, %v95_v21 }
 0x102   :  { %v108_v23 = vsub.f32 %v87_v7, %v106_v22  ;;  %v394_v7 = vld [vmem:[%s565_s8] sm:$0xff] }
 0x103   :  { %298 = vmatpush.bf16.msra.mxu2 %v394_v7 }
 0x104   :  { %v110_v24 = vmul.f32 %v108_v23, %v108_v23 }
 0x106   :  { %v112_v25 = vsel %vm67_vm0, %v110_v24, 0.0 }
 0x107   :  { %113 = vadd.xlane.f32.xlu1 %v112_v25  ;;  %v98_v26 = vpop.xlane.xlu0 %97 }
 0x108   :  { %v107_v27 = vmul.f32 %v105_v20, %v98_v26 }
 0x10a   :  { %v109_v28 = vsub.f32 %v88_v12, %v107_v27  ;;  %v420_v12 = vmov 0.0  }
 0x10b   :  { %159 = vst.msk [vmem:[#allocation4] sm:$0xff] %vm67_vm0, %v420_v12 }
 0x10c   :  { %v111_v29 = vmul.f32 %v109_v28, %v109_v28  ;;  %160 = vst.msk [vmem:[#allocation4 + $0x8] sm:$0xff] %vm67_vm0, %v420_v12 }
 0x10e   :  { %v115_v30 = vsel %vm67_vm0, %v111_v29, 0.0 }
 0x10f   :  { %116 = vadd.xlane.f32.xlu1 %v115_v30 }
 0x17a   :  { %v114_v31 = vpop.xlane.xlu1 %113 }
 0x17b   :  { %v118_v32 = vmul.f32 %v114_v31, %v105_v20 }
 0x17d   :  { %v120_v33 = vadd.f32 1e-05, %v118_v32 }
 0x17f   :  { %411 = vrsqrt.f32 %v120_v33  ;;  %vm128_vm3 = vweird.f32 %v120_v33 }
 0x182   :  { %v117_v35 = vpop.xlane.xlu1 %116 }
 0x183   :  { %v119_v36 = vmul.f32 %v117_v35, %v105_v20 }
 0x185   :  { %v412_v38 = vpop.eup %411  ;;  %v121_v39 = vadd.f32 1e-05, %v119_v36  ;;  %v225_v36 = vld [vmem:[#allocation4 + $0x8] sm:$0xff] }
 0x186   :  { %v123_v40 = vmul.f32 %v412_v38, %v120_v33  ;;  %vm129_vm2 = vweird.f32 %v412_v38  ;;  %v224_v33 = vld [vmem:[#allocation4] sm:$0xff] }
 0x187   :  { %413 = vrsqrt.f32 %v121_v39  ;;  %vm130_vm4 = vmor %vm128_vm3, %vm129_vm2  ;;  %vm138_vm7 = vweird.f32 %v121_v39 }
 0x188   :  { %v124_v41 = vmul.f32 %v412_v38, %v123_v40  ;;  %v312_v40 = vld [vmem:[#allocation2] sm:$0xff] }
 0x18a   :  { %v125_v42 = vmul.f32 0.5, %v124_v41 }
 0x18c   :  { %v126_v43 = vsub.f32 1.5, %v125_v42 }
 0x18d   :  { %v414_v44 = vpop.eup %413 }
 0x18e   :  { %v127_v45 = vmul.f32 %v412_v38, %v126_v43  ;;  %v133_v46 = vmul.f32 %v414_v44, %v121_v39  ;;  %vm139_vm5 = vweird.f32 %v414_v44 }
 0x18f   :  { %vm140_vm8 = vmor %vm138_vm7, %vm139_vm5 }
 0x190   :  { %v131_v48 = vsel %vm130_vm4, %v412_v38, %v127_v45  ;;  %v134_v49 = vmul.f32 %v414_v44, %v133_v46  ;;  %v408_v38 = vld [vmem:[%s564_s9] ss:$0 sm:$0xff] }
 0x191   :  { %v142_v51 = vmul.f32 %v131_v48, %v108_v23 }
 0x192   :  { %v135_v52 = vmul.f32 0.5, %v134_v49 }
 0x193   :  { %v147_v53 = vmul.f32 %v405_v47, %v142_v51 }
 0x194   :  { %v136_v54 = vsub.f32 1.5, %v135_v52 }
 0x195   :  { %v152_v55 = vadd.f32 %v406_v50, %v147_v53 }
 0x196   :  { %v137_v56 = vmul.f32 %v414_v44, %v136_v54 }
 0x197   :  { %v154_v57 = vpack.c.bf16 %v152_v55, %v152_v55 }
 0x198   :  { %v141_v58 = vsel %vm140_vm8, %v414_v44, %v137_v56  ;;  %v313_v44 = vld [vmem:[#allocation2 + $0x8] sm:$0xff] }
 0x199   :  { %157 = vst.msk [vmem:[#allocation3] sm:$0xf] %vm156_vm6, %v154_v57  ;;  %v143_v59 = vmul.f32 %v141_v58, %v109_v28 }
 0x19b   :  { %v148_v60 = vmul.f32 %v405_v47, %v143_v59 }
 0x19d   :  { %v153_v61 = vadd.f32 %v406_v50, %v148_v60 }
 0x19f   :  { %v155_v62 = vpack.c.bf16 %v153_v61, %v153_v61 }
 0x1a1   :  { %158 = vst.msk [vmem:[#allocation3 + $0x4] sm:$0xf] %vm156_vm6, %v155_v62 }
 0x1a8   :  { %v391_v63 = vld [vmem:[#allocation3] sm:$0xff] }
 0x1a9   :  { %355 = vmatmul.msk.bf16.vlgmr.msra.gmra.mxu1 %vm67_vm0, %v391_v63 }
 0x226   :  { %v201_v9 = vpop.f32.mrf.mxu1 }
 0x227   :  { %v202_v10 = vadd.f32 %v407_v8, %v201_v9 }
 0x229   :  { %v208_v11 = vmul.f32 %v202_v10, %v202_v10  ;;  %v206_v27 = vmul.f32 0.5, %v202_v10 }
 0x22b   :  { %v210_v13 = vmul.f32 %v208_v11, %v202_v10 }
 0x22d   :  { %v212_v14 = vmul.f32 0.044715, %v210_v13 }
 0x22e   :  { %v203_v15 = vpop.f32.mrf.mxu1 }
 0x22f   :  { %v204_v16 = vadd.f32 %v407_v8, %v203_v15  ;;  %v214_v17 = vadd.f32 %v212_v14, %v202_v10 }
 0x231   :  { %v209_v18 = vmul.f32 %v204_v16, %v204_v16  ;;  %v216_v20 = vmul.f32 0.7978846, %v214_v17  ;;  %v207_v28 = vmul.f32 0.5, %v204_v16 }
 0x233   :  { %v211_v19 = vmul.f32 %v209_v18, %v204_v16  ;;  %415 = vtanh.f32 %v216_v20 }
 0x235   :  { %v213_v21 = vmul.f32 0.044715, %v211_v19 }
 0x237   :  { %v215_v22 = vadd.f32 %v213_v21, %v204_v16 }
 0x239   :  { %v217_v23 = vmul.f32 0.7978846, %v215_v22  ;;  %v416_v24 = vpop.eup %415 }
 0x23a   :  { %v220_v25 = vadd.f32 1.0, %v416_v24 }
 0x23b   :  { %417 = vtanh.f32 %v217_v23 }
 0x23c   :  { %v222_v30 = vmul.f32 %v220_v25, %v206_v27 }
 0x241   :  { %v418_v26 = vpop.eup %417 }
 0x242   :  { %v221_v29 = vadd.f32 1.0, %v418_v26 }
 0x244   :  { %v223_v31 = vmul.f32 %v221_v29, %v207_v28 }
 0x246   :  { %v226_v32 = vpack.c.bf16 %v223_v31, %v222_v30 }
 0x248   :  { %299 = vmatmul.bf16.vlgmr.msra.gmra.mxu2 %v226_v32 }
 0x2cb   :  { %v300_v34 = vpop.f32.mrf.mxu2 }
 0x2cc   :  { %v305_v35 = vadd.f32 %v300_v34, %v224_v33 }
 0x2ce   :  { %307 = vst.msk [vmem:[#allocation4] sm:$0xff] %vm67_vm0, %v305_v35 }
 0x2d3   :  { %v302_v37 = vpop.f32.mrf.mxu2 }
 0x2d4   :  { %v306_v39 = vadd.f32 %v302_v37, %v225_v36 }
 0x2d5   :  { %v314_v41 = vld [vmem:[#allocation4] sm:$0xff] }
 0x2d6   :  { %v316_v42 = vadd.f32 %v314_v41, %v312_v40  ;;  %308 = vst.msk [vmem:[#allocation4 + $0x8] sm:$0xff] %vm67_vm0, %v306_v39 }
 0x2d8   :  { %v322_v43 = vadd.f32 %v408_v38, %v316_v42 }
 0x2da   :  { %324 = vst.msk [vmem:[%s566_s10] sm:$0xff] %vm67_vm0, %v322_v43 }
 0x2dd   :  { %v315_v45 = vld [vmem:[#allocation4 + $0x8] sm:$0xff] }
 0x2de   :  { %v317_v46 = vadd.f32 %v315_v45, %v313_v44 }
 0x2e0   :  { %v323_v47 = vadd.f32 %v408_v38, %v317_v46 }
 0x2e2   :  { %325 = vst.msk [vmem:[%s566_s10 + $0x8] sm:$0xff] %vm67_vm0, %v323_v47 }

// kernel: gpt_forward.9
= control target key start
LH: loop header
LB: loop body
LE: loop exit
PB: predicated region body
PF: predicated region fallthrough
CT: control target
= control target key end

     0   :  { %s1069_s12 = smov 0   ;;  %s1071_s13 = smov 0   ;;  %s1236_s0 = inlined_call_operand.vmem [shape: bf16[3,2,8,32], index: 0, kind: input, shape index: {}, may-alias: {0,1,2}]   ;;  %s1237_s1 = inlined_call_operand.vmem [shape: bf16[3,2,8,32], index: 1, kind: input, shape index: {}, may-alias: {0,1,2}]   ;;  %s1238_s2 = inlined_call_operand.vmem [shape: bf16[3,2,8,32], index: 2, kind: input, shape index: {}, may-alias: {0,1,2}]   ;;  %s1239_s3 = inlined_call_operand.vmem [shape: bf16[2,8,32], index: 3, kind: output, shape index: {}]  }
   0x1   :  { %s1073_s14 = smov 0  }
   0x2 LB: > { %s32_s15 = sadd.s32 1, %s1034_s13  ;;  %p933_p0 = scmp.ge.s32.totalorder %s1038_s14, 1  ;;  %s1038_s14 = sphi %s1073_s14, %s13_s14   ;;  %s1034_s13 = sphi %s1071_s13, %s1241_s13   ;;  %s1030_s12 = sphi %s1069_s12, %s1240_s12  }
   0x3   : > { %p34_p1 = scmp.ge.s32.totalorder %s32_s15, 2  ;;  %p208_p2 = scmp.lt.s32.totalorder %s1038_s14, 3 }
   0x5   : > { %s1243_s15 = smov (%p34_p1, %s32_s15), 0  ;;  %p209_p3 = pnand %p933_p0, %p208_p2 }
   0x6   : > { %p256_p4 = scmp.lt.s32.totalorder (!%p209_p3), %s1030_s12, 1  ;;  %s1043_s23 = smov (!%p209_p3), 120  }
   0x7   : > { %212 = sbr.rel (%p209_p3) target bundleno = 1148 (0x47c), region = 32  ;;  %s1044_s24 = smov (!%p209_p3), 112  }
   0x8   : > { %s1045_s25 = smov (!%p209_p3), 104   ;;  %s1046_s5 = smov (!%p209_p3), 8  }
   0x9   : > { %s1047_s6 = smov (!%p209_p3), 24   ;;  %s1048_s7 = smov (!%p209_p3), 16  }
   0xc   : > { %s1245_s12 = smov (!%p256_p4, %s1030_s12), 1  ;;  %vm308_vm0 = vcmask 64512   ;;  %v1040_v3 = vmov 0.0   ;;  %vm299_vm1 = vcmask 7168   ;;  %v1041_v4 = vmov -inf  }
   0xd   : > { %s1087_s16 = sshll.u32 %s1245_s12, 2  ;;  %309 = vst.msk [vmem:[#allocation4] sm:$0xff] %vm308_vm0, %v1040_v3  ;;  %v318_v5 = vlaneseq  ;;  %v1042_v17 = vmov 0   ;;  %vm389_vm3 = vcmask 1043456   ;;  %vm721_vm8 = vcmask 60416  }
   0xe   : > { %s1093_s19 = scalar_lea.vmem %s1237_s1, %s1087_s16  ;;  %s1101_s22 = scalar_lea.vmem %s1236_s0, %s1087_s16  ;;  %310 = vst.msk [vmem:[#allocation4 + $0x8] sm:$0xff] %vm308_vm0, %v1040_v3  ;;  %989 = vset.pattern.permute.xlu1 %v1042_v17  ;;  %990 = vset.pattern.permute.xlu2 %v1042_v17 }
   0xf   : > { %v938_v0 = vld [vmem:[%s1093_s19 + $0x8] sm:$0xf]  ;;  %v329_v2 = vld [vmem:[%s1101_s22] sm:$0xf]  ;;  %311 = vst.msk [vmem:[#allocation4 + $0x10] sm:$0xff] %vm308_vm0, %v1040_v3  ;;  %v319_v6 = vshrl.u32 %v318_v5, 7  ;;  %991 = vset.pattern.permute.xlu0 %v1042_v17  ;;  %s1148_s28 = scalar_lea.vmem %s1238_s2, %s1087_s16  ;;  %s1221_s4 = scalar_lea.vmem %s1239_s3, %s1087_s16 }
  0x10   : > { %v337_v1 = vsel %vm308_vm0, %v938_v0, 0  ;;  %312 = vst.msk [vmem:[#allocation4 + $0x18] sm:$0xff] %vm308_vm0, %v1040_v3  ;;  %v324_v7 = vand.u32 127, %v318_v5  ;;  %v942_v14 = vld [vmem:[%s1093_s19 + $0x8] sm:$0xf] }
  0x11   : > { %346 = vmatpush.bf16.xpose.msra.mxu0 %v337_v1  ;;  %300 = vst.msk [vmem:[#allocation2] sm:$0xff] %vm299_vm1, %v1041_v4  ;;  %v418_v15 = vunpack.c.l.b16 %v942_v14  ;;  %v946_v18 = vld [vmem:[%s1093_s19 + $0x8] sm:$0xf]  ;;  %v599_v23 = vld [vmem:[%s1101_s22] sm:$0xf] }
  0x12   : > { %301 = vst.msk [vmem:[#allocation2 + $0x8] sm:$0xff] %vm299_vm1, %v1041_v4  ;;  %vm327_vm2 = vcmp.gt.s32.totalorder %v324_v7, %v319_v6  ;;  %v513_v19 = vunpack.c.l.b16 %v946_v18  ;;  %v950_v21 = vld [vmem:[%s1093_s19 + $0x8] sm:$0xf]  ;;  %v603_v25 = vunpack.c.l.b16 %v599_v23  ;;  %v409_v29 = vld [vmem:[%s1101_s22] sm:$0xf] }
  0x13   : > { %302 = vst.msk [vmem:[#allocation2 + $0x10] sm:$0xff] %vm299_vm1, %v1041_v4  ;;  %v1117_v9 = vsel %vm327_vm2, -1e+30, %v1040_v3  ;;  %v419_v16 = vpack.c.b16 %v418_v15, %v418_v15  ;;  %v608_v22 = vunpack.c.l.b16 %v950_v21  ;;  %v413_v32 = vunpack.c.l.b16 %v409_v29  ;;  %v504_v34 = vld [vmem:[%s1101_s22] sm:$0xf] }
  0x14   : > { %303 = vst.msk [vmem:[#allocation2 + $0x18] sm:$0xff] %vm299_vm1, %v1041_v4  ;;  %v514_v20 = vpack.c.b16 %v513_v19, %v513_v19  ;;  %v604_v26 = vpack.c.b16 %v603_v25, %v603_v25  ;;  %v508_v35 = vunpack.c.l.b16 %v504_v34  ;;  %v939_v40 = vld [vmem:[%s1148_s28 + $0x10] sm:$0xf] }
  0x15   : > { %304 = vst.msk [vmem:[#allocation3] sm:$0xff] %vm299_vm1, %v1040_v3  ;;  %v609_v24 = vpack.c.b16 %v608_v22, %v608_v22  ;;  %v414_v33 = vpack.c.b16 %v413_v32, %v413_v32  ;;  %v391_v41 = vsel %vm389_vm3, %v939_v40, 0  ;;  %v943_v5 = vld [vmem:[%s1148_s28 + $0x10] sm:$0xf] }
  0x16   : > { %305 = vst.msk [vmem:[#allocation3 + $0x8] sm:$0xff] %vm299_vm1, %v1040_v3  ;;  %515 = vrot.lane.b32.xlu2 %v514_v20, %s1044_s24  ;;  %v509_v36 = vpack.c.b16 %v508_v35, %v508_v35  ;;  %400 = vmatpush.bf16.msra.mxu1 %v391_v41  ;;  %v478_v7 = vunpack.c.l.b16 %v943_v5  ;;  %v951_v21 = vld [vmem:[%s1148_s28 + $0x10] sm:$0xf] }
  0x17   : > { %306 = vst.msk [vmem:[#allocation3 + $0x10] sm:$0xff] %vm299_vm1, %v1040_v3  ;;  %v668_v22 = vunpack.c.l.b16 %v951_v21 }
  0x18   : > { %940 = vmatmul.msk.bf16.vlgmr.msra.gmra.mxu0 %vm308_vm0, %v329_v2  ;;  %307 = vst.msk [vmem:[#allocation3 + $0x18] sm:$0xff] %vm299_vm1, %v1040_v3  ;;  %v1128_v27 = vld [vmem:[#allocation2] sm:$0xff] }
  0x19   : > { %v444_v17 = vld [vmem:[#allocation2 + $0x8] sm:$0xff]  ;;  %v669_v25 = vpack.c.b16 %v668_v22, %v668_v22 }
  0x1a   : > { %v539_v23 = vld [vmem:[#allocation2 + $0x10] sm:$0xff] }
  0x1c   : > { %v370_v35 = vld [vmem:[#allocation3] sm:$0xff] }
  0x1e   : > { %610 = vrot.lane.b32.xlu2 %v609_v24, %s1045_s25  ;;  %v556_v22 = vld [vmem:[#allocation3 + $0x10] sm:$0xff] }
  0x26   : > { %605 = vrot.lane.b32.xlu2 %v604_v26, %s1045_s25 }
  0x70   : > { %v516_v39 = vpop.permute.xlu2 %515 }
  0x71   : > { %v521_v42 = vsel %vm308_vm0, %v516_v39, 0 }
  0x72   : > { %530 = vmatpush.bf16.xpose.msrb.mxu1 %v521_v42 }
  0x78   : > { %v611_v43 = vpop.permute.xlu2 %610 }
  0x79   : > { %v616_v44 = vsel %vm308_vm0, %v611_v43, 0 }
  0x7a   : > { %625 = vmatpush.bf16.xpose.msrb.mxu0 %v616_v44 }
  0x80   : > { %v606_v45 = vpop.permute.xlu2 %605 }
  0x81   : > { %952 = vmatmul.msk.bf16.vlgmr.msrb.gmra.mxu0 %vm308_vm0, %v606_v45 }
  0x95   : > { %v348_v8 = vpop.f32.mrf.mxu0 }
  0x96   : > { %v352_v10 = vmul.f32 0.35355338, %v348_v8  ;;  %v479_v8 = vpack.c.b16 %v478_v7, %v478_v7 }
  0x98   : > { %v353_v11 = vadd.f32 %v352_v10, %v1117_v9  ;;  %v947_v10 = vld [vmem:[%s1148_s28 + $0x10] sm:$0xf] }
  0x9a   : > { %v355_v12 = vsel %vm308_vm0, %v353_v11, -inf }
  0x9b   : > { %356 = vmax.xlane.f32.xlu0 %v355_v12 }
  0x9d   : > { %v350_v13 = vpop.f32.mrf.mxu0 }
  0xaf   : > { %420 = vrot.lane.b32.xlu0 %v419_v16, %s1043_s23 }
  0xfe   : > { %v627_v53 = vpop.f32.mrf.mxu0 }
  0xff   : > { %v631_v54 = vmul.f32 0.35355338, %v627_v53 }
 0x101   : > { %v1159_v55 = vadd.f32 %v631_v54, %v1117_v9 }
 0x103   : > { %v635_v56 = vsel %vm308_vm0, %v1159_v55, -inf }
 0x104   : > { %636 = vmax.xlane.f32.xlu0 %v635_v56 }
 0x106   : > { %v629_v57 = vpop.f32.mrf.mxu0 }
 0x10e   : > { %v357_v28 = vpop.xlane.xlu0 %356 }
 0x10f   : > { %v1133_v30 = vmax.f32 %v1128_v27, %v357_v28 }
 0x111   : > { %v359_v31 = vsub.f32 %v1128_v27, %v1133_v30  ;;  %408 = vst.msk [vmem:[#allocation2] sm:$0xff] %vm299_vm1, %v1133_v30  ;;  %364 = vperm.xlu1 %989, %v1133_v30  }
 0x113   : > { %v360_v32 = vmul.f32 1.442695, %v359_v31 }
 0x119   : > { %415 = vrot.lane.b32.xlu1 %v414_v33, %s1043_s23 }
 0x121   : > { %510 = vrot.lane.b32.xlu1 %v509_v36, %s1044_s24  ;;  %v421_v37 = vpop.permute.xlu0 %420 }
 0x122   : > { %v426_v38 = vsel %vm308_vm0, %v421_v37, 0 }
 0x123   : > { %435 = vmatpush.bf16.xpose.msra.mxu2 %v426_v38 }
 0x177   : > { %v637_v14 = vpop.xlane.xlu0 %636 }
 0x183   : > { %v365_v46 = vpop.permute.xlu1 %364 }
 0x184   : > { %v367_v47 = vsub.f32 %v353_v11, %v365_v46  ;;  %v573_v11 = vunpack.c.l.b16 %v947_v10 }
 0x186   : > { %v368_v48 = vmul.f32 1.442695, %v367_v47  ;;  %v574_v12 = vpack.c.b16 %v573_v11, %v573_v11 }
 0x188   : > { %992 = vpow2.f32 %v368_v48 }
 0x189   : > { %994 = vpow2.f32 %v360_v32  ;;  %v378_v32 = vld [vmem:[#allocation4] sm:$0xff] }
 0x18b   : > { %v416_v49 = vpop.permute.xlu1 %415 }
 0x18c   : > { %944 = vmatmul.msk.bf16.vlgmr.msra.gmra.mxu2 %vm308_vm0, %v416_v49 }
 0x18e   : > { %v993_v50 = vpop.eup %992 }
 0x18f   : > { %v385_v51 = vpack.c.bf16 %v993_v50, %v993_v50  ;;  %v372_v13 = vsel %vm308_vm0, %v993_v50, 0.0  ;;  %v995_v34 = vpop.eup %994 }
 0x190   : > { %v371_v37 = vmul.f32 %v995_v34, %v370_v35 }
 0x191   : > { %941 = vmatmul.msk.bf16.vlgmr.msra.gmra.mxu1 %vm308_vm0, %v385_v51 }
 0x193   : > { %v511_v52 = vpop.permute.xlu1 %510 }
 0x1a1   : > { %948 = vmatmul.msk.bf16.vlgmr.msrb.gmra.mxu1 %vm308_vm0, %v511_v52 }
 0x20e   : > { %v1163_v58 = vpop.f32.mrf.mxu1 }
 0x20f   : > { %v437_v59 = vpop.f32.mrf.mxu2 }
 0x210   : > { %v441_v60 = vmul.f32 0.35355338, %v437_v59 }
 0x212   : > { %v442_v61 = vadd.f32 %v441_v60, %v1117_v9 }
 0x214   : > { %v445_v62 = vsel %vm308_vm0, %v442_v61, -inf }
 0x215   : > { %446 = vmax.xlane.f32.xlu1 %v445_v62 }
 0x216   : > { %v404_v63 = vpop.f32.mrf.mxu1 }
 0x217   : > { %v439_v0 = vpop.f32.mrf.mxu2 }
 0x21e   : > { %v532_v1 = vpop.f32.mrf.mxu1 }
 0x21f   : > { %v536_v2 = vmul.f32 0.35355338, %v532_v1 }
 0x221   : > { %v1168_v3 = vadd.f32 %v536_v2, %v1117_v9  ;;  %v1177_v9 = vld [vmem:[#allocation2 + $0x18] sm:$0xff]  ;;  %v461_v2 = vld [vmem:[#allocation3 + $0x8] sm:$0xff] }
 0x222   : > { %v1180_v15 = vmax.f32 %v1177_v9, %v637_v14 }
 0x223   : > { %v540_v4 = vsel %vm308_vm0, %v1168_v3, -inf }
 0x224   : > { %541 = vmax.xlane.f32.xlu2 %v540_v4  ;;  %v639_v16 = vsub.f32 %v1177_v9, %v1180_v15  ;;  %693 = vst.msk [vmem:[#allocation2 + $0x18] sm:$0xff] %vm299_vm1, %v1180_v15 }
 0x226   : > { %v534_v6 = vpop.f32.mrf.mxu1  ;;  %v640_v0 = vmul.f32 1.442695, %v639_v16 }
 0x227   : > { %v651_v6 = vld [vmem:[#allocation3 + $0x18] sm:$0xff] }
 0x22e   : > { %480 = vrot.lane.b32.xlu1 %v479_v8, %s1043_s23 }
 0x236   : > { %575 = vrot.lane.b32.xlu1 %v574_v12, %s1044_s24 }
 0x260   : > { %373 = vadd.xlane.f32.xlu1 %v372_v13 }
 0x288   : > { %v447_v18 = vpop.xlane.xlu1 %446 }
 0x289   : > { %v448_v19 = vmax.f32 %v444_v17, %v447_v18 }
 0x28b   : > { %v449_v20 = vsub.f32 %v444_v17, %v448_v19  ;;  %503 = vst.msk [vmem:[#allocation2 + $0x8] sm:$0xff] %vm299_vm1, %v448_v19  ;;  %454 = vperm.xlu2 %990, %v448_v19   ;;  %v469_v17 = vld [vmem:[#allocation4 + $0x8] sm:$0xff] }
 0x28d   : > { %v450_v54 = vmul.f32 1.442695, %v449_v20 }
 0x293   : > { %644 = vperm.xlu2 %990, %v1180_v15  }
 0x297   : > { %v542_v24 = vpop.xlane.xlu2 %541 }
 0x298   : > { %v543_v26 = vmax.f32 %v539_v23, %v542_v24 }
 0x29a   : > { %v544_v28 = vsub.f32 %v539_v23, %v543_v26  ;;  %598 = vst.msk [vmem:[#allocation2 + $0x10] sm:$0xff] %vm299_vm1, %v543_v26  ;;  %549 = vperm.xlu0 %991, %v543_v26  }
 0x29b   : > { %670 = vrot.lane.b32.xlu2 %v669_v25, %s1045_s25 }
 0x29c   : > { %v545_v52 = vmul.f32 1.442695, %v544_v28 }
 0x2a0   : > { %v481_v29 = vpop.permute.xlu1 %480 }
 0x2a1   : > { %v486_v36 = vsel %vm389_vm3, %v481_v29, 0 }
 0x2a2   : > { %495 = vmatpush.bf16.msra.mxu3 %v486_v36 }
 0x2a8   : > { %v576_v33 = vpop.permute.xlu1 %575 }
 0x2a9   : > { %v581_v46 = vsel %vm389_vm3, %v576_v33, 0 }
 0x2aa   : > { %590 = vmatpush.bf16.msrb.mxu3 %v581_v46 }
 0x2d3   : > { %v374_v38 = vpop.xlane.xlu1 %373 }
 0x2d4   : > { %v375_v39 = vadd.f32 %v374_v38, %v371_v37  ;;  %v564_v38 = vld [vmem:[#allocation4 + $0x10] sm:$0xff] }
 0x2d6   : > { %377 = vst.msk [vmem:[#allocation3] sm:$0xff] %vm299_vm1, %v375_v39 }
 0x2dd   : > { %v699_v57 = vld [vmem:[#allocation3] sm:$0xff] }
 0x2e5   : > { %v455_v40 = vpop.permute.xlu2 %454 }
 0x2e6   : > { %v457_v41 = vsub.f32 %v442_v61, %v455_v40 }
 0x2e8   : > { %v458_v42 = vmul.f32 1.442695, %v457_v41  ;;  %v659_v41 = vld [vmem:[#allocation4 + $0x18] sm:$0xff] }
 0x2ea   : > { %996 = vpow2.f32 %v458_v42 }
 0x2ed   : > { %v645_v43 = vpop.permute.xlu2 %644 }
 0x2ee   : > { %v647_v27 = vsub.f32 %v1159_v55, %v645_v43 }
 0x2f0   : > { %v997_v30 = vpop.eup %996  ;;  %v648_v31 = vmul.f32 1.442695, %v647_v27 }
 0x2f1   : > { %v463_v44 = vsel %vm308_vm0, %v997_v30, 0.0  ;;  %v476_v45 = vpack.c.bf16 %v997_v30, %v997_v30 }
 0x2f2   : > { %998 = vpow2.f32 %v648_v31  ;;  %464 = vadd.xlane.f32.xlu0 %v463_v44 }
 0x2f3   : > { %945 = vmatmul.msk.bf16.vlgmr.msra.gmra.mxu3 %vm308_vm0, %v476_v45  ;;  %1000 = vpow2.f32 %v545_v52 }
 0x2f4   : > { %1002 = vpow2.f32 %v450_v54 }
 0x2f5   : > { %v671_v47 = vpop.permute.xlu2 %670 }
 0x2f6   : > { %v676_v48 = vsel %vm389_vm3, %v671_v47, 0 }
 0x2f7   : > { %685 = vmatpush.bf16.msrb.mxu2 %v676_v48 }
 0x2f8   : > { %v999_v49 = vpop.eup %998 }
 0x2f9   : > { %v653_v50 = vsel %vm308_vm0, %v999_v49, 0.0  ;;  %v666_v51 = vpack.c.bf16 %v999_v49, %v999_v49  ;;  %v1001_v53 = vpop.eup %1000 }
 0x2fa   : > { %654 = vadd.xlane.f32.xlu1 %v653_v50  ;;  %v1003_v60 = vpop.eup %1002  ;;  %v557_v24 = vmul.f32 %v1001_v53, %v556_v22 }
 0x2fb   : > { %953 = vmatmul.msk.bf16.vlgmr.msrb.gmra.mxu2 %vm308_vm0, %v666_v51 }
 0x306   : > { %567 = vperm.xlu0 %991, %v1001_v53  }
 0x30c   : > { %v550_v55 = vpop.permute.xlu0 %549 }
 0x30d   : > { %v552_v56 = vsub.f32 %v1168_v3, %v550_v55  ;;  %v462_v3 = vmul.f32 %v1003_v60, %v461_v2 }
 0x30e   : > { %702 = vperm.xlu0 %991, %v699_v57  }
 0x30f   : > { %v553_v59 = vmul.f32 1.442695, %v552_v56 }
 0x311   : > { %1004 = vpow2.f32 %v553_v59 }
 0x312   : > { %1006 = vpow2.f32 %v640_v0 }
 0x313   : > { %472 = vperm.xlu1 %989, %v1003_v60  }
 0x317   : > { %v1005_v61 = vpop.eup %1004 }
 0x318   : > { %v558_v62 = vsel %vm308_vm0, %v1005_v61, 0.0  ;;  %v571_v63 = vpack.c.bf16 %v1005_v61, %v1005_v61  ;;  %v1007_v1 = vpop.eup %1006 }
 0x319   : > { %559 = vadd.xlane.f32.xlu2 %v558_v62  ;;  %v652_v7 = vmul.f32 %v1007_v1, %v651_v6 }
 0x31a   : > { %949 = vmatmul.msk.bf16.vlgmr.msrb.gmra.mxu3 %vm308_vm0, %v571_v63 }
 0x331   : > { %381 = vperm.xlu2 %990, %v995_v34  }
 0x339   : > { %662 = vperm.xlu2 %990, %v1007_v1  }
 0x365   : > { %v465_v4 = vpop.xlane.xlu0 %464 }
 0x366   : > { %v466_v5 = vadd.f32 %v465_v4, %v462_v3 }
 0x368   : > { %467 = vst.msk [vmem:[#allocation3 + $0x8] sm:$0xff] %vm299_vm1, %v466_v5 }
 0x36d   : > { %v655_v8 = vpop.xlane.xlu1 %654 }
 0x36e   : > { %v656_v10 = vadd.f32 %v655_v8, %v652_v7 }
 0x36f   : > { %v726_v11 = vld [vmem:[#allocation3 + $0x8] sm:$0xff] }
 0x370   : > { %657 = vst.msk [vmem:[#allocation3 + $0x18] sm:$0xff] %vm299_vm1, %v656_v10  ;;  %729 = vperm.xlu1 %989, %v726_v11  }
 0x376   : > { %v497_v12 = vpop.f32.mrf.mxu3 }
 0x377   : > { %v788_v13 = vld [vmem:[#allocation3 + $0x18] sm:$0xff] }
 0x378   : > { %791 = vperm.xlu1 %989, %v788_v13   ;;  %v568_v9 = vpop.permute.xlu0 %567 }
 0x379   : > { %v570_v43 = vmul.f32 %v568_v9, %v564_v38 }
 0x37e   : > { %v499_v14 = vpop.f32.mrf.mxu3  ;;  %v687_v15 = vpop.f32.mrf.mxu2 }
 0x380   : > { %v703_v16 = vpop.permute.xlu0 %702 }
 0x381   : > { %1008 = vrcp.f32 %v703_v16  ;;  %v716_v40 = vand.u32 2147483648, %v703_v16  ;;  %vm710_vm5 = vweird.f32 %v703_v16  ;;  %v714_v42 = vand.u32 2147483647, %v703_v16 }
 0x383   : > { %v717_v45 = vor.u32 1.1754944e-38, %v716_v40  ;;  %vm715_vm7 = vcmp.eq.f32.partialorder %v714_v42, 8.507059e+37 }
 0x385   : > { %v473_v18 = vpop.permute.xlu1 %472 }
 0x386   : > { %v475_v19 = vmul.f32 %v473_v18, %v469_v17  ;;  %v689_v20 = vpop.f32.mrf.mxu2 }
 0x387   : > { %v1009_v23 = vpop.eup %1008 }
 0x388   : > { %v501_v21 = vadd.f32 %v497_v12, %v475_v19  ;;  %v706_v26 = vmul.f32 %v1009_v23, %v703_v16  ;;  %vm711_vm4 = vweird.f32 %v1009_v23 }
 0x389   : > { %vm712_vm6 = vmor %vm710_vm5, %vm711_vm4  ;;  %vm752_vm5 = vcmask 126016  }
 0x38a   : > { %502 = vst.msk [vmem:[#allocation4 + $0x8] sm:$0xff] %vm308_vm0, %v501_v21  ;;  %v707_v29 = vsub.f32 1.0, %v706_v26 }
 0x38c   : > { %v560_v25 = vpop.xlane.xlu2 %559  ;;  %v708_v34 = vmul.f32 %v1009_v23, %v707_v29 }
 0x38d   : > { %v561_v28 = vadd.f32 %v560_v25, %v557_v24 }
 0x38e   : > { %v709_v39 = vadd.f32 %v1009_v23, %v708_v34 }
 0x38f   : > { %562 = vst.msk [vmem:[#allocation3 + $0x10] sm:$0xff] %vm299_vm1, %v561_v28 }
 0x390   : > { %v713_v30 = vsel %vm712_vm6, %v1009_v23, %v709_v39  ;;  %vm783_vm6 = vcmask 191616  }
 0x391   : > { %v718_v47 = vsel %vm715_vm7, %v717_v45, %v713_v30  ;;  %v724_v2 = vld [vmem:[#allocation4 + $0x8] sm:$0xff]  ;;  %vm814_vm7 = vcmask 257216  }
 0x394   : > { %v382_v33 = vpop.permute.xlu2 %381 }
 0x395   : > { %v384_v35 = vmul.f32 %v382_v33, %v378_v32 }
 0x396   : > { %v757_v36 = vld [vmem:[#allocation3 + $0x10] sm:$0xff] }
 0x397   : > { %v406_v37 = vadd.f32 %v1163_v58, %v384_v35  ;;  %760 = vperm.xlu0 %991, %v757_v36  }
 0x399   : > { %407 = vst.msk [vmem:[#allocation4] sm:$0xff] %vm308_vm0, %v406_v37 }
 0x39c   : > { %v663_v27 = vpop.permute.xlu2 %662 }
 0x39d   : > { %v665_v31 = vmul.f32 %v663_v27, %v659_v41  ;;  %v592_v44 = vpop.f32.mrf.mxu3 }
 0x39e   : > { %v596_v46 = vadd.f32 %v592_v44, %v570_v43 }
 0x39f   : > { %v691_v58 = vadd.f32 %v687_v15, %v665_v31 }
 0x3a0   : > { %597 = vst.msk [vmem:[#allocation4 + $0x10] sm:$0xff] %vm308_vm0, %v596_v46  ;;  %v698_v48 = vld [vmem:[#allocation4] sm:$0xff] }
 0x3a1   : > { %692 = vst.msk [vmem:[#allocation4 + $0x18] sm:$0xff] %vm308_vm0, %v691_v58  ;;  %v719_v49 = vmul.f32 %v718_v47, %v698_v48 }
 0x3a3   : > { %v720_v50 = vpack.c.bf16 %v719_v49, %v719_v49 }
 0x3a5   : > { %v594_v51 = vpop.f32.mrf.mxu3  ;;  %722 = vst.msk [vmem:[%s1221_s4] sm:$0xf] %vm721_vm8, %v720_v50 }
 0x3a7   : > { %v755_v28 = vld [vmem:[#allocation4 + $0x10] sm:$0xff] }
 0x3a8   : > { %v786_v9 = vld [vmem:[#allocation4 + $0x18] sm:$0xff] }
 0x3e2   : > { %v730_v52 = vpop.permute.xlu1 %729 }
 0x3e3   : > { %1010 = vrcp.f32 %v730_v52  ;;  %v743_v57 = vand.u32 2147483648, %v730_v52  ;;  %v741_v60 = vand.u32 2147483647, %v730_v52  ;;  %vm737_vm10 = vweird.f32 %v730_v52 }
 0x3e5   : > { %v744_v63 = vor.u32 1.1754944e-38, %v743_v57  ;;  %vm742_vm12 = vcmp.eq.f32.partialorder %v741_v60, 8.507059e+37 }
 0x3e9   : > { %v1011_v53 = vpop.eup %1010 }
 0x3ea   : > { %v733_v54 = vmul.f32 %v1011_v53, %v730_v52  ;;  %v792_v55 = vpop.permute.xlu1 %791  ;;  %vm738_vm9 = vweird.f32 %v1011_v53 }
 0x3eb   : > { %1012 = vrcp.f32 %v792_v55  ;;  %vm739_vm11 = vmor %vm737_vm10, %vm738_vm9  ;;  %v805_v6 = vand.u32 2147483648, %v792_v55  ;;  %v803_v8 = vand.u32 2147483647, %v792_v55  ;;  %vm799_vm14 = vweird.f32 %v792_v55 }
 0x3ec   : > { %v734_v56 = vsub.f32 1.0, %v733_v54 }
 0x3ed   : > { %v806_v12 = vor.u32 1.1754944e-38, %v805_v6  ;;  %vm804_vm0 = vcmp.eq.f32.partialorder %v803_v8, 8.507059e+37 }
 0x3ee   : > { %v735_v59 = vmul.f32 %v1011_v53, %v734_v56 }
 0x3f0   : > { %v736_v61 = vadd.f32 %v1011_v53, %v735_v59 }
 0x3f1   : > { %v1013_v62 = vpop.eup %1012 }
 0x3f2   : > { %v795_v0 = vmul.f32 %v1013_v62, %v792_v55  ;;  %v740_v1 = vsel %vm739_vm11, %v1011_v53, %v736_v61  ;;  %vm800_vm13 = vweird.f32 %v1013_v62 }
 0x3f3   : > { %v745_v3 = vsel %vm742_vm12, %v744_v63, %v740_v1  ;;  %vm801_vm15 = vmor %vm799_vm14, %vm800_vm13 }
 0x3f4   : > { %v796_v4 = vsub.f32 1.0, %v795_v0  ;;  %v746_v5 = vmul.f32 %v745_v3, %v724_v2 }
 0x3f6   : > { %v797_v7 = vmul.f32 %v1013_v62, %v796_v4  ;;  %v747_v10 = vpack.c.bf16 %v746_v5, %v746_v5 }
 0x3f8   : > { %v798_v11 = vadd.f32 %v1013_v62, %v797_v7  ;;  %749 = vrot.lane.b32.xlu2 %v747_v10, %s1046_s5 }
 0x3fa   : > { %v802_v13 = vsel %vm801_vm15, %v1013_v62, %v798_v11 }
 0x3fb   : > { %v807_v14 = vsel %vm804_vm0, %v806_v12, %v802_v13 }
 0x3fc   : > { %v808_v15 = vmul.f32 %v807_v14, %v786_v9 }
 0x3fe   : > { %v809_v16 = vpack.c.bf16 %v808_v15, %v808_v15 }
 0x400   : > { %811 = vrot.lane.b32.xlu0 %v809_v16, %s1047_s6 }
 0x409   : > { %v761_v17 = vpop.permute.xlu0 %760 }
 0x40a   : > { %1014 = vrcp.f32 %v761_v17  ;;  %v774_v21 = vand.u32 2147483648, %v761_v17  ;;  %v772_v23 = vand.u32 2147483647, %v761_v17  ;;  %vm768_vm2 = vweird.f32 %v761_v17 }
 0x40c   : > { %v775_v25 = vor.u32 1.1754944e-38, %v774_v21  ;;  %vm773_vm4 = vcmp.eq.f32.partialorder %v772_v23, 8.507059e+37 }
 0x410   : > { %v1015_v18 = vpop.eup %1014 }
 0x411   : > { %v764_v19 = vmul.f32 %v1015_v18, %v761_v17  ;;  %vm769_vm1 = vweird.f32 %v1015_v18 }
 0x412   : > { %vm770_vm3 = vmor %vm768_vm2, %vm769_vm1 }
 0x413   : > { %v765_v20 = vsub.f32 1.0, %v764_v19 }
 0x415   : > { %v766_v22 = vmul.f32 %v1015_v18, %v765_v20 }
 0x417   : > { %v767_v24 = vadd.f32 %v1015_v18, %v766_v22 }
 0x419   : > { %v771_v26 = vsel %vm770_vm3, %v1015_v18, %v767_v24 }
 0x41a   : > { %v776_v29 = vsel %vm773_vm4, %v775_v25, %v771_v26 }
 0x41b   : > { %v777_v32 = vmul.f32 %v776_v29, %v755_v28 }
 0x41d   : > { %v778_v33 = vpack.c.bf16 %v777_v32, %v777_v32 }
 0x41f   : > { %780 = vrot.lane.b32.xlu2 %v778_v33, %s1048_s7 }
 0x452   : > { %v750_v34 = vpop.permute.xlu2 %749 }
 0x453   : > { %753 = vst.msk [vmem:[%s1221_s4] sm:$0xf] %vm752_vm5, %v750_v34 }
 0x472   : > { %v812_v36 = vpop.permute.xlu0 %811 }
 0x479   : > { %v781_v35 = vpop.permute.xlu2 %780 }
 0x47a   : > { %784 = vst.msk [vmem:[%s1221_s4] sm:$0xf] %vm783_vm6, %v781_v35 }
 0x47b   : > { %815 = vst.msk [vmem:[%s1221_s4] sm:$0xf] %vm814_vm7, %v812_v36 }
 0x47c PF: > { %s13_s14 = sadd.s32 1, %s1038_s14   ;;  %s1240_s12 = smov %s1034_s13 }
 0x47d   : > { %p10_p5 = scmp.ge.s32.totalorder %s13_s14, 4   ;;  %s1241_s13 = smov %s1243_s15 }
 0x47f   :  { %12 = sbr.rel (!%p10_p5) target bundleno = 2 (0x2), region = 95 }

// kernel: gpt_forward.15
= control target key start
LH: loop header
LB: loop body
LE: loop exit
PB: predicated region body
PF: predicated region fallthrough
CT: control target
= control target key end

     0   :  { %s202_s0 = inlined_call_operand.vmem [shape: bf16[16,32], index: 0, kind: input, shape index: {}]   ;;  %s203_s1 = inlined_call_operand.vmem [shape: bf16[32,256], index: 1, kind: input, shape index: {}]   ;;  %s204_s2 = inlined_call_operand.hbm [shape: f32[16,256], index: 2, kind: output, shape index: {}]  }
   0x1   :  { %v112_v0 = vld [vmem:[%s203_s1 + $0x10] sm:$0xf]  ;;  %v124_v1 = vld [vmem:[%s203_s1 + $0x14] sm:$0xf0]  ;;  %v123_v2 = vld [vmem:[%s203_s1 + $0x14] sm:$0xf] }
   0x2   :  { %v113_v3 = vor.u32 %v124_v1, %v112_v0  ;;  %v114_v4 = vld [vmem:[%s203_s1 + $0x18] sm:$0xf0]  ;;  %v104_v5 = vld [vmem:[%s203_s1] sm:$0xf]  ;;  %v122_v6 = vld [vmem:[%s203_s1 + $0x4] sm:$0xf0] }
   0x3   :  { %v117_v7 = vor.u32 %v123_v2, %v114_v4  ;;  %v121_v8 = vld [vmem:[%s203_s1 + $0x4] sm:$0xf]  ;;  %v106_v9 = vld [vmem:[%s203_s1 + $0x8] sm:$0xf0]  ;;  %v105_v10 = vor.u32 %v122_v6, %v104_v5 }
   0x4   :  { %54 = vmatpush.bf16.msra.mxu0 %v113_v3 }
   0x5   :  { %7 = vsyncpa [#allocation3], 0  ;;  %68 = vmatpush.bf16.msra.mxu1 %v117_v7  ;;  %v109_v11 = vor.u32 %v121_v8, %v106_v9  ;;  %v120_v12 = vld [vmem:[%s202_s0] sm:$0xff]  ;;  %vm44_vm0 = vcmask 261120   ;;  %s154_s27 = smov [#allocation2]   ;;  %s86_s30 = sshll.u32 %s204_s2, 4  ;;  %s87_s30 = int_to_ptr.hbm [resolvable:$true] %s86_s30 }
   0x6   :  { %s84_s1 = sshll.u32 %s154_s27, 4  ;;  %s155_s0 = smov 256   ;;  %s85_s1 = int_to_ptr.vmem [resolvable:$true] %s84_s1 }
   0x7   :  { %s156_s3 = smov 16  }
   0x8   :  { %55 = vmatpush.bf16.msra.mxu0 %v105_v10 }
   0x9   :  { %69 = vmatpush.bf16.msra.mxu1 %v109_v11 }
   0xb   :  { %118 = vmatmul.msk.bf16.vlgmr.msra.gmra.mxu0 %vm44_vm0, %v120_v12 }
   0xc   :  { %119 = vmatmul.msk.bf16.vlgmr.msra.gmra.mxu1 %vm44_vm0, %v120_v12 }
  0x88   :  { %v57_v13 = vpop.f32.mrf.mxu0 }
  0x89   :  { %76 = vst [vmem:[#allocation2] sm:$0xff] %v57_v13  ;;  %v71_v14 = vpop.f32.mrf.mxu1 }
  0x8a   :  { %77 = vst [vmem:[#allocation2 + $0x8] sm:$0xff] %v71_v14 }
  0x90   :  { %v59_v15 = vpop.f32.mrf.mxu0 }
  0x91   :  { %78 = vst [vmem:[#allocation2 + $0x10] sm:$0xff] %v59_v15  ;;  %v73_v16 = vpop.f32.mrf.mxu1 }
  0x92   :  { %79 = vst [vmem:[#allocation2 + $0x18] sm:$0xff] %v73_v16 }
  0x93   :  { %92 = dma.vmem_to_hbm [thread:$0]  %s85_s1, 512, %s87_s30, [#allocation3], %s155_s0, %s155_s0, %s156_s3  }
  0x94   :  { %152 = dma.done.wait [#allocation3], 512  }
  0x95   :  { %153 = vsyncadd [#allocation3], 4294966784 }
  0x96   :  { %97 = vsyncpa [#allocation3], 1 }

</bundles_post_ra>
